<compile_context>
chip_gen: v7x
topology: tpu7x:2x2x1
jax: 0.10.0
libtpu: 0.0.40
codegen_flags: <defaults>
</compile_context>

<pallas_src>
import jax
import jax.numpy as jnp
from jax.experimental import pallas as pl
from jax.experimental.pallas import tpu as pltpu


# ----------------------------------------------------------------------------
# Pallas kernel: one (batch, point-tile) block per grid step.
# All compute arrays are (rows, TN) with TN on the lane axis.
# ----------------------------------------------------------------------------
def ptblock_kernel(
    xc_ref,   # (C, TN)      centroid features, f32 (also used for residual)
    x_ref,    # (S, C, TN)   neighbor features, bf16, sample-leading
    pc_ref,   # (3, TN)      centroid coords, f32
    p_ref,    # (S, 3, TN)   neighbor coords, f32, sample-leading
    # fused (conv1x1 + BN) affine maps; weights bf16, biases f32 of shape (*, 1)
    w_tp,           # linear_top ∘ phi fold : (H, C)   (bias folded into b_g1)
    w_pa,           # psi ++ alpha          : (2H, C)  (biases folded elsewhere)
    w_d1, b_d1,     # delta layer 1         : (H, 3),  (H, 1)
    w_d2,           # delta layer 2         : (H, H)   (bias folded elsewhere)
    w_g1, b_g1,     # gamma layer 1         : (H, H),  (H, 1) [pre-folded]
    w_g2,           # gamma layer 2         : (H, H)   (bias dropped: softmax)
    w_dn, b_dn,     # linear_down           : (C, H),  (C, 1)
    b_ad,           # alpha+delta fused bias: (H, 1)
    out_ref,  # (C, TN)
):
    f32 = jnp.float32
    bf16 = jnp.bfloat16

    S = x_ref.shape[0]
    TN = xc_ref.shape[1]
    H = w_g1.shape[0]

    xc = xc_ref[...]                              # (C, TN) f32, kept for residual
    pc = pc_ref[...]                              # (3, TN) f32

    # --- centroid path: fused linear_top ∘ phi (bias folded into b_g1) ------
    phi0 = jnp.dot(w_tp[...], xc.astype(bf16),
                   preferred_element_type=f32)    # (H, TN)

    # Hoist weight loads / bias broadcasts out of the unrolled sample loop.
    w_pa_v = w_pa[...]
    w_d1_v = w_d1[...]
    w_d2_v = w_d2[...]
    w_g1_v = w_g1[...]
    w_g2_v = w_g2[...]
    b_d1_b = jnp.broadcast_to(b_d1[...], (H, TN))
    b_g1_b = jnp.broadcast_to(b_g1[...], (H, TN))
    b_ad_b = jnp.broadcast_to(b_ad[...], (H, TN))

    # --- per-sample pass: everything stays (rows, TN) lane-dense -------------
    g_list = []
    ad_list = []
    for s in range(S):
        x_s = x_ref[s]                            # (C, TN) bf16

        # psi & alpha in one (2H, C) matmul (biases folded out).
        pa = jnp.dot(w_pa_v, x_s, preferred_element_type=f32)   # (2H, TN)
        psi0 = pa[:H, :]
        alpha0 = pa[H:, :]

        # positional encoding delta(p_i - p_j)
        pipj = (pc - p_ref[s]).astype(bf16)                      # (3, TN)
        d1 = jnp.maximum(
            jnp.dot(w_d1_v, pipj, preferred_element_type=f32) + b_d1_b, 0.0)
        delta0 = jnp.dot(w_d2_v, d1.astype(bf16),
                         preferred_element_type=f32)             # (H, TN)

        # gamma MLP on (phi_i - psi_j + delta_ij); constant biases pre-folded
        # into b_g1.
        g_in = (phi0 - psi0 + delta0).astype(bf16)
        g1 = jnp.maximum(
            jnp.dot(w_g1_v, g_in, preferred_element_type=f32) + b_g1_b, 0.0)
        g = jnp.dot(w_g2_v, g1.astype(bf16),
                    preferred_element_type=f32)                  # (H, TN)

        g_list.append(g)
        ad_list.append(alpha0 + delta0 + b_ad_b)                 # (H, TN)

    # --- softmax over samples: sublane-free lane-dense folds over S ----------
    m = g_list[0]
    for s in range(1, S):
        m = jnp.maximum(m, g_list[s])
    den = jnp.zeros((H, TN), f32)
    num = jnp.zeros((H, TN), f32)
    for s in range(S):
        e = jnp.exp(g_list[s] - m)
        den = den + e
        num = num + e * ad_list[s]
    # Exact divide on the small (H, TN) array (cheap, better accuracy than the
    # approximate reciprocal).
    y = num / den                                                # (H, TN)

    # --- linear_down + residual ----------------------------------------------
    out = jnp.dot(w_dn[...], y.astype(bf16),
                  preferred_element_type=f32) + b_dn[...]        # (C, TN)
    out_ref[...] = out + xc


# ----------------------------------------------------------------------------
# Generation-aware VMEM budget / limit.
# ----------------------------------------------------------------------------
def _vmem_budget():
    try:
        cap = int(pltpu.get_tpu_info().vmem_capacity_bytes)
    except Exception:
        cap = 128 * 1024 * 1024
    # v7x (64 MiB/TC): ~22 MiB tile budget, 48 MiB scoped limit.
    # v5e/v6e (128 MiB): ~45 MiB tile budget, 96 MiB scoped limit.
    budget = min(int(cap * 0.35), 56 * 1024 * 1024)
    limit = min(int(cap * 0.75), 100 * 1024 * 1024)
    return budget, limit


def _est_vmem(tn, S, C, H):
    """Estimated live VMEM bytes for one grid step (incl. double buffers)."""
    L = tn * S
    inputs = 2 * (2 * C * L            # x block, bf16, double buffered
                  + 4 * 3 * L          # p block, f32
                  + 4 * (C + 3) * tn   # xc + pc blocks, f32
                  + 4 * C * tn)        # out block, f32
    inter = 2 * 4 * H * L              # stored per-sample g / (alpha+delta)
    inter += 10 * 4 * H * tn           # transient per-sample working set
    inter += 4 * 4 * max(C, H) * tn    # softmax combine / down-proj staging
    weights = 1 * 1024 * 1024          # resident weights + slack
    return inputs + inter + weights


def _choose_tile_n(N, S, C, H, B, budget):
    # Candidate tiles: 128-aligned divisors of N (keeps blocks (8,128)-legal).
    cands = [d for d in range(N, 0, -1) if N % d == 0 and d % 128 == 0]
    if not cands:
        # TODO(synk): pad N to a multiple of 128 when it has no 128-aligned
        # divisor; for now fall back to a single full-width tile.
        return N
    tile = None
    for t in cands:
        if _est_vmem(t, S, C, H) <= budget:
            tile = t
            break
    if tile is None:
        tile = cands[-1]   # smallest legal tile; may still exceed the budget
    # Ensure at least 2 total grid steps so both TensorCores on multi-core
    # parts (v7x) get work even for batch-1 inputs.
    if B * (N // tile) < 2:
        smaller = [t for t in cands if t < tile and t >= 256]
        if smaller:
            tile = smaller[0]
    return tile


# ----------------------------------------------------------------------------
# Trace-time weight prep: fold top∘phi, concat psi/alpha, fold constant biases,
# cast matmul operands to bf16.
# ----------------------------------------------------------------------------
def _prep_kernel_weights(params):
    w_top, b_top = params["top"]
    w_phi, b_phi = params["phi"]
    w_tp = w_phi @ w_top                   # (H, C)
    b_tp = w_phi @ b_top + b_phi           # (H, 1)

    w_psi, b_psi = params["psi"]
    w_alp, b_alp = params["alpha"]
    w_pa = jnp.concatenate([w_psi, w_alp], axis=0)   # (2H, C)

    w_g1, b_g1 = params["g1"]
    w_g2, _b_g2 = params["g2"]    # b_g2 dropped: softmax over samples is shift-invariant
    w_d1, b_d1 = params["d1"]
    w_d2, b_d2 = params["d2"]
    w_dn, b_dn = params["down"]

    # phi / psi biases and delta's 2nd-layer bias are constant across samples
    # inside gamma's input -> fold them into gamma's first-layer bias.
    b_g1f = b_g1 + w_g1 @ (b_tp - b_psi + b_d2)      # (H, 1)
    # alpha + delta share one fused bias.
    b_ad = b_alp + b_d2                              # (H, 1)

    bf16 = jnp.bfloat16
    f32 = jnp.float32
    return (
        w_tp.astype(bf16),
        w_pa.astype(bf16),
        w_d1.astype(bf16), b_d1.astype(f32),
        w_d2.astype(bf16),
        w_g1.astype(bf16), b_g1f.astype(f32),
        w_g2.astype(bf16),
        w_dn.astype(bf16), b_dn.astype(f32),
        b_ad.astype(f32),
    )


# ----------------------------------------------------------------------------
# Wrapper: one transpose (+bf16 cast) of the big neighbor tensors so the
# point axis is lane-dense everywhere; output is produced directly as (B,C,N).
# ----------------------------------------------------------------------------
@jax.jit
def ptblock_forward(input_p_centroids, input_x_centroids, input_p, input_x,
                    params):
    B, C, N, S = input_x.shape
    H = params["g1"][0].shape[0]

    budget, vmem_limit = _vmem_budget()
    tile_n = _choose_tile_n(N, S, C, H, B, budget)
    n_tiles = N // tile_n

    # (B, C, N, S) -> (B, S, C, N): sample-leading, point axis last (lane-dense
    # blocks, free per-sample slab indexing inside the kernel).  bf16 cast
    # fuses with the transpose and halves the dominant DMA / VMEM bytes.
    x_t = jnp.transpose(input_x, (0, 3, 1, 2)).astype(jnp.bfloat16)  # (B,S,C,N)
    p_t = jnp.transpose(input_p, (0, 3, 1, 2))                       # (B,S,3,N)

    kernel_weights = _prep_kernel_weights(params)

    data_specs = [
        pl.BlockSpec((None, C, tile_n), lambda b, nt: (b, 0, nt)),
        pl.BlockSpec((None, S, C, tile_n), lambda b, nt: (b, 0, 0, nt)),
        pl.BlockSpec((None, 3, tile_n), lambda b, nt: (b, 0, nt)),
        pl.BlockSpec((None, S, 3, tile_n), lambda b, nt: (b, 0, 0, nt)),
    ]
    # Constant index maps: the small weights stay resident in VMEM across the
    # grid (DMA only re-issued when the block index changes).
    weight_specs = [pl.BlockSpec(a.shape, lambda b, nt: (0, 0))
                    for a in kernel_weights]

    return pl.pallas_call(
        ptblock_kernel,
        out_shape=jax.ShapeDtypeStruct((B, C, N), jnp.float32),
        grid=(B, n_tiles),
        in_specs=data_specs + weight_specs,
        out_specs=pl.BlockSpec((None, C, tile_n), lambda b, nt: (b, 0, nt)),
        compiler_params=pltpu.CompilerParams(
            dimension_semantics=("parallel", "parallel"),
            vmem_limit_bytes=vmem_limit),
    )(input_x_centroids, x_t, input_p_centroids, p_t, *kernel_weights)


# ----------------------------------------------------------------------------
# Deterministic parameter construction (conv1x1 + inference-mode BN fused),
# stored channels-first: W (Cout, Cin), b (Cout, 1).
# ----------------------------------------------------------------------------
def fused_conv_bn(key, cin, cout, eps=1e-5):
    k1, k2, k3, k4, k5, k6 = jax.random.split(key, 6)
    w = jax.random.normal(k1, (cout, cin), jnp.float32) * 0.2
    b = jax.random.normal(k2, (cout,), jnp.float32) * 0.1
    gamma = jax.random.uniform(k3, (cout,), jnp.float32, 0.5, 1.5)
    beta = jax.random.normal(k4, (cout,), jnp.float32) * 0.1
    mean = jax.random.normal(k5, (cout,), jnp.float32) * 0.1
    var = jax.random.uniform(k6, (cout,), jnp.float32, 0.5, 1.5)
    scale = gamma / jnp.sqrt(var + eps)
    w_f = w * scale[:, None]                      # (cout, cin)
    b_f = ((b - mean) * scale + beta)[:, None]    # (cout, 1)
    return w_f, b_f


def make_params(key, in_dim):
    hidden = in_dim // 2
    keys = jax.random.split(key, 9)
    return {
        "top":   fused_conv_bn(keys[0], in_dim, hidden),
        "phi":   fused_conv_bn(keys[1], hidden, hidden),
        "psi":   fused_conv_bn(keys[2], in_dim, hidden),
        "alpha": fused_conv_bn(keys[3], in_dim, hidden),
        "g1":    fused_conv_bn(keys[4], hidden, hidden),
        "g2":    fused_conv_bn(keys[5], hidden, hidden),
        "d1":    fused_conv_bn(keys[6], 3, hidden),
        "d2":    fused_conv_bn(keys[7], hidden, hidden),
        "down":  fused_conv_bn(keys[8], hidden, in_dim),
    }


# ----------------------------------------------------------------------------
# Pure-JAX f32 reference (same math as the PyTorch module, inference BN).
# ----------------------------------------------------------------------------
def _affine(w, b, t):
    y = jnp.einsum("oi,bi...->bo...", w, t)
    return y + b.reshape((1, -1) + (1,) * (t.ndim - 2))


def ptblock_reference(input_p_centroids, input_x_centroids, input_p, input_x,
                      prm):
    xc = input_x_centroids
    h = _affine(*prm["top"], xc)
    phi = _affine(*prm["phi"], h)                               # (B, H, N)
    psi = _affine(*prm["psi"], input_x)                         # (B, H, N, S)
    alpha = _affine(*prm["alpha"], input_x)
    pipj = input_p_centroids[:, :, :, None] - input_p           # (B, 3, N, S)
    d = _affine(*prm["d2"], jnp.maximum(_affine(*prm["d1"], pipj), 0.0))
    gin = phi[:, :, :, None] - psi + d
    g = _affine(*prm["g2"], jnp.maximum(_affine(*prm["g1"], gin), 0.0))
    attn = jax.nn.softmax(g, axis=-1)
    y = jnp.sum(attn * (alpha + d), axis=-1)                    # (B, H, N)
    y = _affine(*prm["down"], y)
    return y + xc                                               # (B, C, N)


if __name__ == "__main__":
    B, in_dim, npoint, nsample = 2, 8, 16, 8

    key = jax.random.PRNGKey(0)
    kp, kxc, kpc, kx, kparam = jax.random.split(key, 5)

    input_x = jax.random.normal(kx, (B, in_dim, npoint, nsample), jnp.float32)
    input_x_centroids = jax.random.normal(kxc, (B, in_dim, npoint), jnp.float32)
    input_p = jax.random.normal(kp, (B, 3, npoint, nsample), jnp.float32)
    input_p_centroids = jax.random.normal(kpc, (B, 3, npoint), jnp.float32)

    params = make_params(kparam, in_dim)

    out = ptblock_forward(input_p_centroids, input_x_centroids,
                          input_p, input_x, params)
    out = jax.block_until_ready(out)

    ref = ptblock_reference(input_p_centroids, input_x_centroids,
                            input_p, input_x, params)
    assert out.shape == (B, in_dim, npoint), out.shape
    # Tolerance covers bf16 MXU operands / bf16 x input (f32 accumulation);
    # softmax normalization uses an exact f32 divide.
    err = float(jnp.max(jnp.abs(out - ref)))
    assert err < 6e-2, err

    print("KERNEL_OK")
</pallas_src>

<mosaic_0001>
module attributes {stable_mosaic.version = 11 : i64} {
  func.func @ptblock_kernel(%arg0: i32, %arg1: i32, %arg2: memref<1x8x16xf32, #tpu.memory_space<vmem>>, %arg3: memref<1x8x8x16xbf16, #tpu.memory_space<vmem>>, %arg4: memref<1x3x16xf32, #tpu.memory_space<vmem>>, %arg5: memref<1x8x3x16xf32, #tpu.memory_space<vmem>>, %arg6: memref<4x8xbf16, #tpu.memory_space<vmem>>, %arg7: memref<8x8xbf16, #tpu.memory_space<vmem>>, %arg8: memref<4x3xbf16, #tpu.memory_space<vmem>>, %arg9: memref<4x1xf32, #tpu.memory_space<vmem>>, %arg10: memref<4x4xbf16, #tpu.memory_space<vmem>>, %arg11: memref<4x4xbf16, #tpu.memory_space<vmem>>, %arg12: memref<4x1xf32, #tpu.memory_space<vmem>>, %arg13: memref<4x4xbf16, #tpu.memory_space<vmem>>, %arg14: memref<8x4xbf16, #tpu.memory_space<vmem>>, %arg15: memref<8x1xf32, #tpu.memory_space<vmem>>, %arg16: memref<4x1xf32, #tpu.memory_space<vmem>>, %arg17: memref<1x8x16xf32, #tpu.memory_space<vmem>>) attributes {dimension_semantics = [#tpu.dimension_semantics<parallel>, #tpu.dimension_semantics<parallel>], iteration_bounds = array<i64: 2, 1>, scalar_prefetch = 0 : i64, scratch_operands = 0 : i64, tpu.core_type = #tpu.core_type<tc>, window_params = [{transform_indices = @transform_0, window_bounds = array<i64: 1, 8, 16>}, {transform_indices = @transform_1, window_bounds = array<i64: 1, 8, 8, 16>}, {transform_indices = @transform_2, window_bounds = array<i64: 1, 3, 16>}, {transform_indices = @transform_3, window_bounds = array<i64: 1, 8, 3, 16>}, {pipeline_mode = #tpu.pipeline_mode<synchronous>, transform_indices = @transform_4, window_bounds = array<i64: 4, 8>}, {pipeline_mode = #tpu.pipeline_mode<synchronous>, transform_indices = @transform_5, window_bounds = array<i64: 8, 8>}, {pipeline_mode = #tpu.pipeline_mode<synchronous>, transform_indices = @transform_6, window_bounds = array<i64: 4, 3>}, {pipeline_mode = #tpu.pipeline_mode<synchronous>, transform_indices = @transform_7, window_bounds = array<i64: 4, 1>}, {pipeline_mode = #tpu.pipeline_mode<synchronous>, transform_indices = @transform_8, window_bounds = array<i64: 4, 4>}, {pipeline_mode = #tpu.pipeline_mode<synchronous>, transform_indices = @transform_9, window_bounds = array<i64: 4, 4>}, {pipeline_mode = #tpu.pipeline_mode<synchronous>, transform_indices = @transform_10, window_bounds = array<i64: 4, 1>}, {pipeline_mode = #tpu.pipeline_mode<synchronous>, transform_indices = @transform_11, window_bounds = array<i64: 4, 4>}, {pipeline_mode = #tpu.pipeline_mode<synchronous>, transform_indices = @transform_12, window_bounds = array<i64: 8, 4>}, {pipeline_mode = #tpu.pipeline_mode<synchronous>, transform_indices = @transform_13, window_bounds = array<i64: 8, 1>}, {pipeline_mode = #tpu.pipeline_mode<synchronous>, transform_indices = @transform_14, window_bounds = array<i64: 4, 1>}, {transform_indices = @transform_15, window_bounds = array<i64: 1, 8, 16>}]} {
    %c0 = arith.constant 0 : index
    %c0_0 = arith.constant 0 : index
    %c0_1 = arith.constant 0 : index
    %0 = vector.load %arg2[%c0, %c0_0, %c0_1] : memref<1x8x16xf32, #tpu.memory_space<vmem>>, vector<1x8x16xf32>
    %1 = vector.shape_cast %0 : vector<1x8x16xf32> to vector<8x16xf32>
    %c0_2 = arith.constant 0 : index
    %c0_3 = arith.constant 0 : index
    %c0_4 = arith.constant 0 : index
    %2 = vector.load %arg4[%c0_2, %c0_3, %c0_4] : memref<1x3x16xf32, #tpu.memory_space<vmem>>, vector<1x3x16xf32>
    %3 = vector.shape_cast %2 : vector<1x3x16xf32> to vector<3x16xf32>
    %c0_5 = arith.constant 0 : index
    %c0_6 = arith.constant 0 : index
    %4 = vector.load %arg6[%c0_5, %c0_6] : memref<4x8xbf16, #tpu.memory_space<vmem>>, vector<4x8xbf16>
    %5 = arith.truncf %1 : vector<8x16xf32> to vector<8x16xbf16>
    %cst = arith.constant dense<0.000000e+00> : vector<4x16xf32>
    %6 = tpu.matmul %4, %5, %cst {dimension_numbers = #tpu.dot_dimension_numbers<[1], [0], [0], [1], [0, 0, 1, 1], [], []>} : vector<4x8xbf16>, vector<8x16xbf16>, vector<4x16xf32> -> vector<4x16xf32>
    %c0_7 = arith.constant 0 : index
    %c0_8 = arith.constant 0 : index
    %7 = vector.load %arg7[%c0_7, %c0_8] : memref<8x8xbf16, #tpu.memory_space<vmem>>, vector<8x8xbf16>
    %c0_9 = arith.constant 0 : index
    %c0_10 = arith.constant 0 : index
    %8 = vector.load %arg8[%c0_9, %c0_10] : memref<4x3xbf16, #tpu.memory_space<vmem>>, vector<4x3xbf16>
    %c0_11 = arith.constant 0 : index
    %c0_12 = arith.constant 0 : index
    %9 = vector.load %arg10[%c0_11, %c0_12] : memref<4x4xbf16, #tpu.memory_space<vmem>>, vector<4x4xbf16>
    %c0_13 = arith.constant 0 : index
    %c0_14 = arith.constant 0 : index
    %10 = vector.load %arg11[%c0_13, %c0_14] : memref<4x4xbf16, #tpu.memory_space<vmem>>, vector<4x4xbf16>
    %c0_15 = arith.constant 0 : index
    %c0_16 = arith.constant 0 : index
    %11 = vector.load %arg13[%c0_15, %c0_16] : memref<4x4xbf16, #tpu.memory_space<vmem>>, vector<4x4xbf16>
    %c0_17 = arith.constant 0 : index
    %c0_18 = arith.constant 0 : index
    %12 = vector.load %arg9[%c0_17, %c0_18] : memref<4x1xf32, #tpu.memory_space<vmem>>, vector<4x1xf32>
    %13 = vector.shape_cast %12 : vector<4x1xf32> to vector<4x1xf32>
    %14 = vector.broadcast %13 : vector<4x1xf32> to vector<4x16xf32>
    %c0_19 = arith.constant 0 : index
    %c0_20 = arith.constant 0 : index
    %15 = vector.load %arg12[%c0_19, %c0_20] : memref<4x1xf32, #tpu.memory_space<vmem>>, vector<4x1xf32>
    %16 = vector.shape_cast %15 : vector<4x1xf32> to vector<4x1xf32>
    %17 = vector.broadcast %16 : vector<4x1xf32> to vector<4x16xf32>
    %c0_21 = arith.constant 0 : index
    %c0_22 = arith.constant 0 : index
    %18 = vector.load %arg16[%c0_21, %c0_22] : memref<4x1xf32, #tpu.memory_space<vmem>>, vector<4x1xf32>
    %19 = vector.shape_cast %18 : vector<4x1xf32> to vector<4x1xf32>
    %20 = vector.broadcast %19 : vector<4x1xf32> to vector<4x16xf32>
    %c0_23 = arith.constant 0 : index
    %c0_24 = arith.constant 0 : index
    %c0_25 = arith.constant 0 : index
    %c0_26 = arith.constant 0 : index
    %21 = vector.load %arg3[%c0_23, %c0_24, %c0_25, %c0_26] : memref<1x8x8x16xbf16, #tpu.memory_space<vmem>>, vector<1x1x8x16xbf16>
    %22 = vector.shape_cast %21 : vector<1x1x8x16xbf16> to vector<8x16xbf16>
    %cst_27 = arith.constant dense<0.000000e+00> : vector<8x16xf32>
    %23 = tpu.matmul %7, %22, %cst_27 {dimension_numbers = #tpu.dot_dimension_numbers<[1], [0], [0], [1], [0, 0, 1, 1], [], []>} : vector<8x8xbf16>, vector<8x16xbf16>, vector<8x16xf32> -> vector<8x16xf32>
    %24 = vector.extract_strided_slice %23 {offsets = [0, 0], sizes = [4, 16], strides = [1, 1]} : vector<8x16xf32> to vector<4x16xf32>
    %25 = vector.extract_strided_slice %23 {offsets = [4, 0], sizes = [4, 16], strides = [1, 1]} : vector<8x16xf32> to vector<4x16xf32>
    %c0_28 = arith.constant 0 : index
    %c0_29 = arith.constant 0 : index
    %c0_30 = arith.constant 0 : index
    %c0_31 = arith.constant 0 : index
    %26 = vector.load %arg5[%c0_28, %c0_29, %c0_30, %c0_31] : memref<1x8x3x16xf32, #tpu.memory_space<vmem>>, vector<1x1x3x16xf32>
    %27 = vector.shape_cast %26 : vector<1x1x3x16xf32> to vector<3x16xf32>
    %28 = arith.subf %3, %27 : vector<3x16xf32>
    %29 = arith.truncf %28 : vector<3x16xf32> to vector<3x16xbf16>
    %cst_32 = arith.constant dense<0.000000e+00> : vector<4x16xf32>
    %30 = tpu.matmul %8, %29, %cst_32 {dimension_numbers = #tpu.dot_dimension_numbers<[1], [0], [0], [1], [0, 0, 1, 1], [], []>} : vector<4x3xbf16>, vector<3x16xbf16>, vector<4x16xf32> -> vector<4x16xf32>
    %31 = arith.addf %30, %14 : vector<4x16xf32>
    %cst_33 = arith.constant 0.000000e+00 : f32
    %32 = vector.broadcast %cst_33 : f32 to vector<4x16xf32>
    %33 = arith.maximumf %31, %32 : vector<4x16xf32>
    %34 = arith.truncf %33 : vector<4x16xf32> to vector<4x16xbf16>
    %cst_34 = arith.constant dense<0.000000e+00> : vector<4x16xf32>
    %35 = tpu.matmul %9, %34, %cst_34 {dimension_numbers = #tpu.dot_dimension_numbers<[1], [0], [0], [1], [0, 0, 1, 1], [], []>} : vector<4x4xbf16>, vector<4x16xbf16>, vector<4x16xf32> -> vector<4x16xf32>
    %36 = arith.subf %6, %24 : vector<4x16xf32>
    %37 = arith.addf %36, %35 : vector<4x16xf32>
    %38 = arith.truncf %37 : vector<4x16xf32> to vector<4x16xbf16>
    %cst_35 = arith.constant dense<0.000000e+00> : vector<4x16xf32>
    %39 = tpu.matmul %10, %38, %cst_35 {dimension_numbers = #tpu.dot_dimension_numbers<[1], [0], [0], [1], [0, 0, 1, 1], [], []>} : vector<4x4xbf16>, vector<4x16xbf16>, vector<4x16xf32> -> vector<4x16xf32>
    %40 = arith.addf %39, %17 : vector<4x16xf32>
    %cst_36 = arith.constant 0.000000e+00 : f32
    %41 = vector.broadcast %cst_36 : f32 to vector<4x16xf32>
    %42 = arith.maximumf %40, %41 : vector<4x16xf32>
    %43 = arith.truncf %42 : vector<4x16xf32> to vector<4x16xbf16>
    %cst_37 = arith.constant dense<0.000000e+00> : vector<4x16xf32>
    %44 = tpu.matmul %11, %43, %cst_37 {dimension_numbers = #tpu.dot_dimension_numbers<[1], [0], [0], [1], [0, 0, 1, 1], [], []>} : vector<4x4xbf16>, vector<4x16xbf16>, vector<4x16xf32> -> vector<4x16xf32>
    %45 = arith.addf %25, %35 : vector<4x16xf32>
    %46 = arith.addf %45, %20 : vector<4x16xf32>
    %c0_38 = arith.constant 0 : index
    %c1 = arith.constant 1 : index
    %c0_39 = arith.constant 0 : index
    %c0_40 = arith.constant 0 : index
    %47 = vector.load %arg3[%c0_38, %c1, %c0_39, %c0_40] : memref<1x8x8x16xbf16, #tpu.memory_space<vmem>>, vector<1x1x8x16xbf16>
    %48 = vector.shape_cast %47 : vector<1x1x8x16xbf16> to vector<8x16xbf16>
    %cst_41 = arith.constant dense<0.000000e+00> : vector<8x16xf32>
    %49 = tpu.matmul %7, %48, %cst_41 {dimension_numbers = #tpu.dot_dimension_numbers<[1], [0], [0], [1], [0, 0, 1, 1], [], []>} : vector<8x8xbf16>, vector<8x16xbf16>, vector<8x16xf32> -> vector<8x16xf32>
    %50 = vector.extract_strided_slice %49 {offsets = [0, 0], sizes = [4, 16], strides = [1, 1]} : vector<8x16xf32> to vector<4x16xf32>
    %51 = vector.extract_strided_slice %49 {offsets = [4, 0], sizes = [4, 16], strides = [1, 1]} : vector<8x16xf32> to vector<4x16xf32>
    %c0_42 = arith.constant 0 : index
    %c1_43 = arith.constant 1 : index
    %c0_44 = arith.constant 0 : index
    %c0_45 = arith.constant 0 : index
    %52 = vector.load %arg5[%c0_42, %c1_43, %c0_44, %c0_45] : memref<1x8x3x16xf32, #tpu.memory_space<vmem>>, vector<1x1x3x16xf32>
    %53 = vector.shape_cast %52 : vector<1x1x3x16xf32> to vector<3x16xf32>
    %54 = arith.subf %3, %53 : vector<3x16xf32>
    %55 = arith.truncf %54 : vector<3x16xf32> to vector<3x16xbf16>
    %cst_46 = arith.constant dense<0.000000e+00> : vector<4x16xf32>
    %56 = tpu.matmul %8, %55, %cst_46 {dimension_numbers = #tpu.dot_dimension_numbers<[1], [0], [0], [1], [0, 0, 1, 1], [], []>} : vector<4x3xbf16>, vector<3x16xbf16>, vector<4x16xf32> -> vector<4x16xf32>
    %57 = arith.addf %56, %14 : vector<4x16xf32>
    %cst_47 = arith.constant 0.000000e+00 : f32
    %58 = vector.broadcast %cst_47 : f32 to vector<4x16xf32>
    %59 = arith.maximumf %57, %58 : vector<4x16xf32>
    %60 = arith.truncf %59 : vector<4x16xf32> to vector<4x16xbf16>
    %cst_48 = arith.constant dense<0.000000e+00> : vector<4x16xf32>
    %61 = tpu.matmul %9, %60, %cst_48 {dimension_numbers = #tpu.dot_dimension_numbers<[1], [0], [0], [1], [0, 0, 1, 1], [], []>} : vector<4x4xbf16>, vector<4x16xbf16>, vector<4x16xf32> -> vector<4x16xf32>
    %62 = arith.subf %6, %50 : vector<4x16xf32>
    %63 = arith.addf %62, %61 : vector<4x16xf32>
    %64 = arith.truncf %63 : vector<4x16xf32> to vector<4x16xbf16>
    %cst_49 = arith.constant dense<0.000000e+00> : vector<4x16xf32>
    %65 = tpu.matmul %10, %64, %cst_49 {dimension_numbers = #tpu.dot_dimension_numbers<[1], [0], [0], [1], [0, 0, 1, 1], [], []>} : vector<4x4xbf16>, vector<4x16xbf16>, vector<4x16xf32> -> vector<4x16xf32>
    %66 = arith.addf %65, %17 : vector<4x16xf32>
    %cst_50 = arith.constant 0.000000e+00 : f32
    %67 = vector.broadcast %cst_50 : f32 to vector<4x16xf32>
    %68 = arith.maximumf %66, %67 : vector<4x16xf32>
    %69 = arith.truncf %68 : vector<4x16xf32> to vector<4x16xbf16>
    %cst_51 = arith.constant dense<0.000000e+00> : vector<4x16xf32>
    %70 = tpu.matmul %11, %69, %cst_51 {dimension_numbers = #tpu.dot_dimension_numbers<[1], [0], [0], [1], [0, 0, 1, 1], [], []>} : vector<4x4xbf16>, vector<4x16xbf16>, vector<4x16xf32> -> vector<4x16xf32>
    %71 = arith.addf %51, %61 : vector<4x16xf32>
    %72 = arith.addf %71, %20 : vector<4x16xf32>
    %c0_52 = arith.constant 0 : index
    %c2 = arith.constant 2 : index
    %c0_53 = arith.constant 0 : index
    %c0_54 = arith.constant 0 : index
    %73 = vector.load %arg3[%c0_52, %c2, %c0_53, %c0_54] : memref<1x8x8x16xbf16, #tpu.memory_space<vmem>>, vector<1x1x8x16xbf16>
    %74 = vector.shape_cast %73 : vector<1x1x8x16xbf16> to vector<8x16xbf16>
    %cst_55 = arith.constant dense<0.000000e+00> : vector<8x16xf32>
    %75 = tpu.matmul %7, %74, %cst_55 {dimension_numbers = #tpu.dot_dimension_numbers<[1], [0], [0], [1], [0, 0, 1, 1], [], []>} : vector<8x8xbf16>, vector<8x16xbf16>, vector<8x16xf32> -> vector<8x16xf32>
    %76 = vector.extract_strided_slice %75 {offsets = [0, 0], sizes = [4, 16], strides = [1, 1]} : vector<8x16xf32> to vector<4x16xf32>
    %77 = vector.extract_strided_slice %75 {offsets = [4, 0], sizes = [4, 16], strides = [1, 1]} : vector<8x16xf32> to vector<4x16xf32>
    %c0_56 = arith.constant 0 : index
    %c2_57 = arith.constant 2 : index
    %c0_58 = arith.constant 0 : index
    %c0_59 = arith.constant 0 : index
    %78 = vector.load %arg5[%c0_56, %c2_57, %c0_58, %c0_59] : memref<1x8x3x16xf32, #tpu.memory_space<vmem>>, vector<1x1x3x16xf32>
    %79 = vector.shape_cast %78 : vector<1x1x3x16xf32> to vector<3x16xf32>
    %80 = arith.subf %3, %79 : vector<3x16xf32>
    %81 = arith.truncf %80 : vector<3x16xf32> to vector<3x16xbf16>
    %cst_60 = arith.constant dense<0.000000e+00> : vector<4x16xf32>
    %82 = tpu.matmul %8, %81, %cst_60 {dimension_numbers = #tpu.dot_dimension_numbers<[1], [0], [0], [1], [0, 0, 1, 1], [], []>} : vector<4x3xbf16>, vector<3x16xbf16>, vector<4x16xf32> -> vector<4x16xf32>
    %83 = arith.addf %82, %14 : vector<4x16xf32>
    %cst_61 = arith.constant 0.000000e+00 : f32
    %84 = vector.broadcast %cst_61 : f32 to vector<4x16xf32>
    %85 = arith.maximumf %83, %84 : vector<4x16xf32>
    %86 = arith.truncf %85 : vector<4x16xf32> to vector<4x16xbf16>
    %cst_62 = arith.constant dense<0.000000e+00> : vector<4x16xf32>
    %87 = tpu.matmul %9, %86, %cst_62 {dimension_numbers = #tpu.dot_dimension_numbers<[1], [0], [0], [1], [0, 0, 1, 1], [], []>} : vector<4x4xbf16>, vector<4x16xbf16>, vector<4x16xf32> -> vector<4x16xf32>
    %88 = arith.subf %6, %76 : vector<4x16xf32>
    %89 = arith.addf %88, %87 : vector<4x16xf32>
    %90 = arith.truncf %89 : vector<4x16xf32> to vector<4x16xbf16>
    %cst_63 = arith.constant dense<0.000000e+00> : vector<4x16xf32>
    %91 = tpu.matmul %10, %90, %cst_63 {dimension_numbers = #tpu.dot_dimension_numbers<[1], [0], [0], [1], [0, 0, 1, 1], [], []>} : vector<4x4xbf16>, vector<4x16xbf16>, vector<4x16xf32> -> vector<4x16xf32>
    %92 = arith.addf %91, %17 : vector<4x16xf32>
    %cst_64 = arith.constant 0.000000e+00 : f32
    %93 = vector.broadcast %cst_64 : f32 to vector<4x16xf32>
    %94 = arith.maximumf %92, %93 : vector<4x16xf32>
    %95 = arith.truncf %94 : vector<4x16xf32> to vector<4x16xbf16>
    %cst_65 = arith.constant dense<0.000000e+00> : vector<4x16xf32>
    %96 = tpu.matmul %11, %95, %cst_65 {dimension_numbers = #tpu.dot_dimension_numbers<[1], [0], [0], [1], [0, 0, 1, 1], [], []>} : vector<4x4xbf16>, vector<4x16xbf16>, vector<4x16xf32> -> vector<4x16xf32>
    %97 = arith.addf %77, %87 : vector<4x16xf32>
    %98 = arith.addf %97, %20 : vector<4x16xf32>
    %c0_66 = arith.constant 0 : index
    %c3 = arith.constant 3 : index
    %c0_67 = arith.constant 0 : index
    %c0_68 = arith.constant 0 : index
    %99 = vector.load %arg3[%c0_66, %c3, %c0_67, %c0_68] : memref<1x8x8x16xbf16, #tpu.memory_space<vmem>>, vector<1x1x8x16xbf16>
    %100 = vector.shape_cast %99 : vector<1x1x8x16xbf16> to vector<8x16xbf16>
    %cst_69 = arith.constant dense<0.000000e+00> : vector<8x16xf32>
    %101 = tpu.matmul %7, %100, %cst_69 {dimension_numbers = #tpu.dot_dimension_numbers<[1], [0], [0], [1], [0, 0, 1, 1], [], []>} : vector<8x8xbf16>, vector<8x16xbf16>, vector<8x16xf32> -> vector<8x16xf32>
    %102 = vector.extract_strided_slice %101 {offsets = [0, 0], sizes = [4, 16], strides = [1, 1]} : vector<8x16xf32> to vector<4x16xf32>
    %103 = vector.extract_strided_slice %101 {offsets = [4, 0], sizes = [4, 16], strides = [1, 1]} : vector<8x16xf32> to vector<4x16xf32>
    %c0_70 = arith.constant 0 : index
    %c3_71 = arith.constant 3 : index
    %c0_72 = arith.constant 0 : index
    %c0_73 = arith.constant 0 : index
    %104 = vector.load %arg5[%c0_70, %c3_71, %c0_72, %c0_73] : memref<1x8x3x16xf32, #tpu.memory_space<vmem>>, vector<1x1x3x16xf32>
    %105 = vector.shape_cast %104 : vector<1x1x3x16xf32> to vector<3x16xf32>
    %106 = arith.subf %3, %105 : vector<3x16xf32>
    %107 = arith.truncf %106 : vector<3x16xf32> to vector<3x16xbf16>
    %cst_74 = arith.constant dense<0.000000e+00> : vector<4x16xf32>
    %108 = tpu.matmul %8, %107, %cst_74 {dimension_numbers = #tpu.dot_dimension_numbers<[1], [0], [0], [1], [0, 0, 1, 1], [], []>} : vector<4x3xbf16>, vector<3x16xbf16>, vector<4x16xf32> -> vector<4x16xf32>
    %109 = arith.addf %108, %14 : vector<4x16xf32>
    %cst_75 = arith.constant 0.000000e+00 : f32
    %110 = vector.broadcast %cst_75 : f32 to vector<4x16xf32>
    %111 = arith.maximumf %109, %110 : vector<4x16xf32>
    %112 = arith.truncf %111 : vector<4x16xf32> to vector<4x16xbf16>
    %cst_76 = arith.constant dense<0.000000e+00> : vector<4x16xf32>
    %113 = tpu.matmul %9, %112, %cst_76 {dimension_numbers = #tpu.dot_dimension_numbers<[1], [0], [0], [1], [0, 0, 1, 1], [], []>} : vector<4x4xbf16>, vector<4x16xbf16>, vector<4x16xf32> -> vector<4x16xf32>
    %114 = arith.subf %6, %102 : vector<4x16xf32>
    %115 = arith.addf %114, %113 : vector<4x16xf32>
    %116 = arith.truncf %115 : vector<4x16xf32> to vector<4x16xbf16>
    %cst_77 = arith.constant dense<0.000000e+00> : vector<4x16xf32>
    %117 = tpu.matmul %10, %116, %cst_77 {dimension_numbers = #tpu.dot_dimension_numbers<[1], [0], [0], [1], [0, 0, 1, 1], [], []>} : vector<4x4xbf16>, vector<4x16xbf16>, vector<4x16xf32> -> vector<4x16xf32>
    %118 = arith.addf %117, %17 : vector<4x16xf32>
    %cst_78 = arith.constant 0.000000e+00 : f32
    %119 = vector.broadcast %cst_78 : f32 to vector<4x16xf32>
    %120 = arith.maximumf %118, %119 : vector<4x16xf32>
    %121 = arith.truncf %120 : vector<4x16xf32> to vector<4x16xbf16>
    %cst_79 = arith.constant dense<0.000000e+00> : vector<4x16xf32>
    %122 = tpu.matmul %11, %121, %cst_79 {dimension_numbers = #tpu.dot_dimension_numbers<[1], [0], [0], [1], [0, 0, 1, 1], [], []>} : vector<4x4xbf16>, vector<4x16xbf16>, vector<4x16xf32> -> vector<4x16xf32>
    %123 = arith.addf %103, %113 : vector<4x16xf32>
    %124 = arith.addf %123, %20 : vector<4x16xf32>
    %c0_80 = arith.constant 0 : index
    %c4 = arith.constant 4 : index
    %c0_81 = arith.constant 0 : index
    %c0_82 = arith.constant 0 : index
    %125 = vector.load %arg3[%c0_80, %c4, %c0_81, %c0_82] : memref<1x8x8x16xbf16, #tpu.memory_space<vmem>>, vector<1x1x8x16xbf16>
    %126 = vector.shape_cast %125 : vector<1x1x8x16xbf16> to vector<8x16xbf16>
    %cst_83 = arith.constant dense<0.000000e+00> : vector<8x16xf32>
    %127 = tpu.matmul %7, %126, %cst_83 {dimension_numbers = #tpu.dot_dimension_numbers<[1], [0], [0], [1], [0, 0, 1, 1], [], []>} : vector<8x8xbf16>, vector<8x16xbf16>, vector<8x16xf32> -> vector<8x16xf32>
    %128 = vector.extract_strided_slice %127 {offsets = [0, 0], sizes = [4, 16], strides = [1, 1]} : vector<8x16xf32> to vector<4x16xf32>
    %129 = vector.extract_strided_slice %127 {offsets = [4, 0], sizes = [4, 16], strides = [1, 1]} : vector<8x16xf32> to vector<4x16xf32>
    %c0_84 = arith.constant 0 : index
    %c4_85 = arith.constant 4 : index
    %c0_86 = arith.constant 0 : index
    %c0_87 = arith.constant 0 : index
    %130 = vector.load %arg5[%c0_84, %c4_85, %c0_86, %c0_87] : memref<1x8x3x16xf32, #tpu.memory_space<vmem>>, vector<1x1x3x16xf32>
    %131 = vector.shape_cast %130 : vector<1x1x3x16xf32> to vector<3x16xf32>
    %132 = arith.subf %3, %131 : vector<3x16xf32>
    %133 = arith.truncf %132 : vector<3x16xf32> to vector<3x16xbf16>
    %cst_88 = arith.constant dense<0.000000e+00> : vector<4x16xf32>
    %134 = tpu.matmul %8, %133, %cst_88 {dimension_numbers = #tpu.dot_dimension_numbers<[1], [0], [0], [1], [0, 0, 1, 1], [], []>} : vector<4x3xbf16>, vector<3x16xbf16>, vector<4x16xf32> -> vector<4x16xf32>
    %135 = arith.addf %134, %14 : vector<4x16xf32>
    %cst_89 = arith.constant 0.000000e+00 : f32
    %136 = vector.broadcast %cst_89 : f32 to vector<4x16xf32>
    %137 = arith.maximumf %135, %136 : vector<4x16xf32>
    %138 = arith.truncf %137 : vector<4x16xf32> to vector<4x16xbf16>
    %cst_90 = arith.constant dense<0.000000e+00> : vector<4x16xf32>
    %139 = tpu.matmul %9, %138, %cst_90 {dimension_numbers = #tpu.dot_dimension_numbers<[1], [0], [0], [1], [0, 0, 1, 1], [], []>} : vector<4x4xbf16>, vector<4x16xbf16>, vector<4x16xf32> -> vector<4x16xf32>
    %140 = arith.subf %6, %128 : vector<4x16xf32>
    %141 = arith.addf %140, %139 : vector<4x16xf32>
    %142 = arith.truncf %141 : vector<4x16xf32> to vector<4x16xbf16>
    %cst_91 = arith.constant dense<0.000000e+00> : vector<4x16xf32>
    %143 = tpu.matmul %10, %142, %cst_91 {dimension_numbers = #tpu.dot_dimension_numbers<[1], [0], [0], [1], [0, 0, 1, 1], [], []>} : vector<4x4xbf16>, vector<4x16xbf16>, vector<4x16xf32> -> vector<4x16xf32>
    %144 = arith.addf %143, %17 : vector<4x16xf32>
    %cst_92 = arith.constant 0.000000e+00 : f32
    %145 = vector.broadcast %cst_92 : f32 to vector<4x16xf32>
    %146 = arith.maximumf %144, %145 : vector<4x16xf32>
    %147 = arith.truncf %146 : vector<4x16xf32> to vector<4x16xbf16>
    %cst_93 = arith.constant dense<0.000000e+00> : vector<4x16xf32>
    %148 = tpu.matmul %11, %147, %cst_93 {dimension_numbers = #tpu.dot_dimension_numbers<[1], [0], [0], [1], [0, 0, 1, 1], [], []>} : vector<4x4xbf16>, vector<4x16xbf16>, vector<4x16xf32> -> vector<4x16xf32>
    %149 = arith.addf %129, %139 : vector<4x16xf32>
    %150 = arith.addf %149, %20 : vector<4x16xf32>
    %c0_94 = arith.constant 0 : index
    %c5 = arith.constant 5 : index
    %c0_95 = arith.constant 0 : index
    %c0_96 = arith.constant 0 : index
    %151 = vector.load %arg3[%c0_94, %c5, %c0_95, %c0_96] : memref<1x8x8x16xbf16, #tpu.memory_space<vmem>>, vector<1x1x8x16xbf16>
    %152 = vector.shape_cast %151 : vector<1x1x8x16xbf16> to vector<8x16xbf16>
    %cst_97 = arith.constant dense<0.000000e+00> : vector<8x16xf32>
    %153 = tpu.matmul %7, %152, %cst_97 {dimension_numbers = #tpu.dot_dimension_numbers<[1], [0], [0], [1], [0, 0, 1, 1], [], []>} : vector<8x8xbf16>, vector<8x16xbf16>, vector<8x16xf32> -> vector<8x16xf32>
    %154 = vector.extract_strided_slice %153 {offsets = [0, 0], sizes = [4, 16], strides = [1, 1]} : vector<8x16xf32> to vector<4x16xf32>
    %155 = vector.extract_strided_slice %153 {offsets = [4, 0], sizes = [4, 16], strides = [1, 1]} : vector<8x16xf32> to vector<4x16xf32>
    %c0_98 = arith.constant 0 : index
    %c5_99 = arith.constant 5 : index
    %c0_100 = arith.constant 0 : index
    %c0_101 = arith.constant 0 : index
    %156 = vector.load %arg5[%c0_98, %c5_99, %c0_100, %c0_101] : memref<1x8x3x16xf32, #tpu.memory_space<vmem>>, vector<1x1x3x16xf32>
    %157 = vector.shape_cast %156 : vector<1x1x3x16xf32> to vector<3x16xf32>
    %158 = arith.subf %3, %157 : vector<3x16xf32>
    %159 = arith.truncf %158 : vector<3x16xf32> to vector<3x16xbf16>
    %cst_102 = arith.constant dense<0.000000e+00> : vector<4x16xf32>
    %160 = tpu.matmul %8, %159, %cst_102 {dimension_numbers = #tpu.dot_dimension_numbers<[1], [0], [0], [1], [0, 0, 1, 1], [], []>} : vector<4x3xbf16>, vector<3x16xbf16>, vector<4x16xf32> -> vector<4x16xf32>
    %161 = arith.addf %160, %14 : vector<4x16xf32>
    %cst_103 = arith.constant 0.000000e+00 : f32
    %162 = vector.broadcast %cst_103 : f32 to vector<4x16xf32>
    %163 = arith.maximumf %161, %162 : vector<4x16xf32>
    %164 = arith.truncf %163 : vector<4x16xf32> to vector<4x16xbf16>
    %cst_104 = arith.constant dense<0.000000e+00> : vector<4x16xf32>
    %165 = tpu.matmul %9, %164, %cst_104 {dimension_numbers = #tpu.dot_dimension_numbers<[1], [0], [0], [1], [0, 0, 1, 1], [], []>} : vector<4x4xbf16>, vector<4x16xbf16>, vector<4x16xf32> -> vector<4x16xf32>
    %166 = arith.subf %6, %154 : vector<4x16xf32>
    %167 = arith.addf %166, %165 : vector<4x16xf32>
    %168 = arith.truncf %167 : vector<4x16xf32> to vector<4x16xbf16>
    %cst_105 = arith.constant dense<0.000000e+00> : vector<4x16xf32>
    %169 = tpu.matmul %10, %168, %cst_105 {dimension_numbers = #tpu.dot_dimension_numbers<[1], [0], [0], [1], [0, 0, 1, 1], [], []>} : vector<4x4xbf16>, vector<4x16xbf16>, vector<4x16xf32> -> vector<4x16xf32>
    %170 = arith.addf %169, %17 : vector<4x16xf32>
    %cst_106 = arith.constant 0.000000e+00 : f32
    %171 = vector.broadcast %cst_106 : f32 to vector<4x16xf32>
    %172 = arith.maximumf %170, %171 : vector<4x16xf32>
    %173 = arith.truncf %172 : vector<4x16xf32> to vector<4x16xbf16>
    %cst_107 = arith.constant dense<0.000000e+00> : vector<4x16xf32>
    %174 = tpu.matmul %11, %173, %cst_107 {dimension_numbers = #tpu.dot_dimension_numbers<[1], [0], [0], [1], [0, 0, 1, 1], [], []>} : vector<4x4xbf16>, vector<4x16xbf16>, vector<4x16xf32> -> vector<4x16xf32>
    %175 = arith.addf %155, %165 : vector<4x16xf32>
    %176 = arith.addf %175, %20 : vector<4x16xf32>
    %c0_108 = arith.constant 0 : index
    %c6 = arith.constant 6 : index
    %c0_109 = arith.constant 0 : index
    %c0_110 = arith.constant 0 : index
    %177 = vector.load %arg3[%c0_108, %c6, %c0_109, %c0_110] : memref<1x8x8x16xbf16, #tpu.memory_space<vmem>>, vector<1x1x8x16xbf16>
    %178 = vector.shape_cast %177 : vector<1x1x8x16xbf16> to vector<8x16xbf16>
    %cst_111 = arith.constant dense<0.000000e+00> : vector<8x16xf32>
    %179 = tpu.matmul %7, %178, %cst_111 {dimension_numbers = #tpu.dot_dimension_numbers<[1], [0], [0], [1], [0, 0, 1, 1], [], []>} : vector<8x8xbf16>, vector<8x16xbf16>, vector<8x16xf32> -> vector<8x16xf32>
    %180 = vector.extract_strided_slice %179 {offsets = [0, 0], sizes = [4, 16], strides = [1, 1]} : vector<8x16xf32> to vector<4x16xf32>
    %181 = vector.extract_strided_slice %179 {offsets = [4, 0], sizes = [4, 16], strides = [1, 1]} : vector<8x16xf32> to vector<4x16xf32>
    %c0_112 = arith.constant 0 : index
    %c6_113 = arith.constant 6 : index
    %c0_114 = arith.constant 0 : index
    %c0_115 = arith.constant 0 : index
    %182 = vector.load %arg5[%c0_112, %c6_113, %c0_114, %c0_115] : memref<1x8x3x16xf32, #tpu.memory_space<vmem>>, vector<1x1x3x16xf32>
    %183 = vector.shape_cast %182 : vector<1x1x3x16xf32> to vector<3x16xf32>
    %184 = arith.subf %3, %183 : vector<3x16xf32>
    %185 = arith.truncf %184 : vector<3x16xf32> to vector<3x16xbf16>
    %cst_116 = arith.constant dense<0.000000e+00> : vector<4x16xf32>
    %186 = tpu.matmul %8, %185, %cst_116 {dimension_numbers = #tpu.dot_dimension_numbers<[1], [0], [0], [1], [0, 0, 1, 1], [], []>} : vector<4x3xbf16>, vector<3x16xbf16>, vector<4x16xf32> -> vector<4x16xf32>
    %187 = arith.addf %186, %14 : vector<4x16xf32>
    %cst_117 = arith.constant 0.000000e+00 : f32
    %188 = vector.broadcast %cst_117 : f32 to vector<4x16xf32>
    %189 = arith.maximumf %187, %188 : vector<4x16xf32>
    %190 = arith.truncf %189 : vector<4x16xf32> to vector<4x16xbf16>
    %cst_118 = arith.constant dense<0.000000e+00> : vector<4x16xf32>
    %191 = tpu.matmul %9, %190, %cst_118 {dimension_numbers = #tpu.dot_dimension_numbers<[1], [0], [0], [1], [0, 0, 1, 1], [], []>} : vector<4x4xbf16>, vector<4x16xbf16>, vector<4x16xf32> -> vector<4x16xf32>
    %192 = arith.subf %6, %180 : vector<4x16xf32>
    %193 = arith.addf %192, %191 : vector<4x16xf32>
    %194 = arith.truncf %193 : vector<4x16xf32> to vector<4x16xbf16>
    %cst_119 = arith.constant dense<0.000000e+00> : vector<4x16xf32>
    %195 = tpu.matmul %10, %194, %cst_119 {dimension_numbers = #tpu.dot_dimension_numbers<[1], [0], [0], [1], [0, 0, 1, 1], [], []>} : vector<4x4xbf16>, vector<4x16xbf16>, vector<4x16xf32> -> vector<4x16xf32>
    %196 = arith.addf %195, %17 : vector<4x16xf32>
    %cst_120 = arith.constant 0.000000e+00 : f32
    %197 = vector.broadcast %cst_120 : f32 to vector<4x16xf32>
    %198 = arith.maximumf %196, %197 : vector<4x16xf32>
    %199 = arith.truncf %198 : vector<4x16xf32> to vector<4x16xbf16>
    %cst_121 = arith.constant dense<0.000000e+00> : vector<4x16xf32>
    %200 = tpu.matmul %11, %199, %cst_121 {dimension_numbers = #tpu.dot_dimension_numbers<[1], [0], [0], [1], [0, 0, 1, 1], [], []>} : vector<4x4xbf16>, vector<4x16xbf16>, vector<4x16xf32> -> vector<4x16xf32>
    %201 = arith.addf %181, %191 : vector<4x16xf32>
    %202 = arith.addf %201, %20 : vector<4x16xf32>
    %c0_122 = arith.constant 0 : index
    %c7 = arith.constant 7 : index
    %c0_123 = arith.constant 0 : index
    %c0_124 = arith.constant 0 : index
    %203 = vector.load %arg3[%c0_122, %c7, %c0_123, %c0_124] : memref<1x8x8x16xbf16, #tpu.memory_space<vmem>>, vector<1x1x8x16xbf16>
    %204 = vector.shape_cast %203 : vector<1x1x8x16xbf16> to vector<8x16xbf16>
    %cst_125 = arith.constant dense<0.000000e+00> : vector<8x16xf32>
    %205 = tpu.matmul %7, %204, %cst_125 {dimension_numbers = #tpu.dot_dimension_numbers<[1], [0], [0], [1], [0, 0, 1, 1], [], []>} : vector<8x8xbf16>, vector<8x16xbf16>, vector<8x16xf32> -> vector<8x16xf32>
    %206 = vector.extract_strided_slice %205 {offsets = [0, 0], sizes = [4, 16], strides = [1, 1]} : vector<8x16xf32> to vector<4x16xf32>
    %207 = vector.extract_strided_slice %205 {offsets = [4, 0], sizes = [4, 16], strides = [1, 1]} : vector<8x16xf32> to vector<4x16xf32>
    %c0_126 = arith.constant 0 : index
    %c7_127 = arith.constant 7 : index
    %c0_128 = arith.constant 0 : index
    %c0_129 = arith.constant 0 : index
    %208 = vector.load %arg5[%c0_126, %c7_127, %c0_128, %c0_129] : memref<1x8x3x16xf32, #tpu.memory_space<vmem>>, vector<1x1x3x16xf32>
    %209 = vector.shape_cast %208 : vector<1x1x3x16xf32> to vector<3x16xf32>
    %210 = arith.subf %3, %209 : vector<3x16xf32>
    %211 = arith.truncf %210 : vector<3x16xf32> to vector<3x16xbf16>
    %cst_130 = arith.constant dense<0.000000e+00> : vector<4x16xf32>
    %212 = tpu.matmul %8, %211, %cst_130 {dimension_numbers = #tpu.dot_dimension_numbers<[1], [0], [0], [1], [0, 0, 1, 1], [], []>} : vector<4x3xbf16>, vector<3x16xbf16>, vector<4x16xf32> -> vector<4x16xf32>
    %213 = arith.addf %212, %14 : vector<4x16xf32>
    %cst_131 = arith.constant 0.000000e+00 : f32
    %214 = vector.broadcast %cst_131 : f32 to vector<4x16xf32>
    %215 = arith.maximumf %213, %214 : vector<4x16xf32>
    %216 = arith.truncf %215 : vector<4x16xf32> to vector<4x16xbf16>
    %cst_132 = arith.constant dense<0.000000e+00> : vector<4x16xf32>
    %217 = tpu.matmul %9, %216, %cst_132 {dimension_numbers = #tpu.dot_dimension_numbers<[1], [0], [0], [1], [0, 0, 1, 1], [], []>} : vector<4x4xbf16>, vector<4x16xbf16>, vector<4x16xf32> -> vector<4x16xf32>
    %218 = arith.subf %6, %206 : vector<4x16xf32>
    %219 = arith.addf %218, %217 : vector<4x16xf32>
    %220 = arith.truncf %219 : vector<4x16xf32> to vector<4x16xbf16>
    %cst_133 = arith.constant dense<0.000000e+00> : vector<4x16xf32>
    %221 = tpu.matmul %10, %220, %cst_133 {dimension_numbers = #tpu.dot_dimension_numbers<[1], [0], [0], [1], [0, 0, 1, 1], [], []>} : vector<4x4xbf16>, vector<4x16xbf16>, vector<4x16xf32> -> vector<4x16xf32>
    %222 = arith.addf %221, %17 : vector<4x16xf32>
    %cst_134 = arith.constant 0.000000e+00 : f32
    %223 = vector.broadcast %cst_134 : f32 to vector<4x16xf32>
    %224 = arith.maximumf %222, %223 : vector<4x16xf32>
    %225 = arith.truncf %224 : vector<4x16xf32> to vector<4x16xbf16>
    %cst_135 = arith.constant dense<0.000000e+00> : vector<4x16xf32>
    %226 = tpu.matmul %11, %225, %cst_135 {dimension_numbers = #tpu.dot_dimension_numbers<[1], [0], [0], [1], [0, 0, 1, 1], [], []>} : vector<4x4xbf16>, vector<4x16xbf16>, vector<4x16xf32> -> vector<4x16xf32>
    %227 = arith.addf %207, %217 : vector<4x16xf32>
    %228 = arith.addf %227, %20 : vector<4x16xf32>
    %229 = arith.maximumf %44, %70 : vector<4x16xf32>
    %230 = arith.maximumf %229, %96 : vector<4x16xf32>
    %231 = arith.maximumf %230, %122 : vector<4x16xf32>
    %232 = arith.maximumf %231, %148 : vector<4x16xf32>
    %233 = arith.maximumf %232, %174 : vector<4x16xf32>
    %234 = arith.maximumf %233, %200 : vector<4x16xf32>
    %235 = arith.maximumf %234, %226 : vector<4x16xf32>
    %cst_136 = arith.constant 0.000000e+00 : f32
    %236 = vector.broadcast %cst_136 : f32 to vector<4x16xf32>
    %cst_137 = arith.constant 0.000000e+00 : f32
    %237 = vector.broadcast %cst_137 : f32 to vector<4x16xf32>
    %238 = arith.subf %44, %235 : vector<4x16xf32>
    %239 = math.exp %238 : vector<4x16xf32>
    %240 = arith.addf %236, %239 : vector<4x16xf32>
    %241 = arith.mulf %239, %46 : vector<4x16xf32>
    %242 = arith.addf %237, %241 : vector<4x16xf32>
    %243 = arith.subf %70, %235 : vector<4x16xf32>
    %244 = math.exp %243 : vector<4x16xf32>
    %245 = arith.addf %240, %244 : vector<4x16xf32>
    %246 = arith.mulf %244, %72 : vector<4x16xf32>
    %247 = arith.addf %242, %246 : vector<4x16xf32>
    %248 = arith.subf %96, %235 : vector<4x16xf32>
    %249 = math.exp %248 : vector<4x16xf32>
    %250 = arith.addf %245, %249 : vector<4x16xf32>
    %251 = arith.mulf %249, %98 : vector<4x16xf32>
    %252 = arith.addf %247, %251 : vector<4x16xf32>
    %253 = arith.subf %122, %235 : vector<4x16xf32>
    %254 = math.exp %253 : vector<4x16xf32>
    %255 = arith.addf %250, %254 : vector<4x16xf32>
    %256 = arith.mulf %254, %124 : vector<4x16xf32>
    %257 = arith.addf %252, %256 : vector<4x16xf32>
    %258 = arith.subf %148, %235 : vector<4x16xf32>
    %259 = math.exp %258 : vector<4x16xf32>
    %260 = arith.addf %255, %259 : vector<4x16xf32>
    %261 = arith.mulf %259, %150 : vector<4x16xf32>
    %262 = arith.addf %257, %261 : vector<4x16xf32>
    %263 = arith.subf %174, %235 : vector<4x16xf32>
    %264 = math.exp %263 : vector<4x16xf32>
    %265 = arith.addf %260, %264 : vector<4x16xf32>
    %266 = arith.mulf %264, %176 : vector<4x16xf32>
    %267 = arith.addf %262, %266 : vector<4x16xf32>
    %268 = arith.subf %200, %235 : vector<4x16xf32>
    %269 = math.exp %268 : vector<4x16xf32>
    %270 = arith.addf %265, %269 : vector<4x16xf32>
    %271 = arith.mulf %269, %202 : vector<4x16xf32>
    %272 = arith.addf %267, %271 : vector<4x16xf32>
    %273 = arith.subf %226, %235 : vector<4x16xf32>
    %274 = math.exp %273 : vector<4x16xf32>
    %275 = arith.addf %270, %274 : vector<4x16xf32>
    %276 = arith.mulf %274, %228 : vector<4x16xf32>
    %277 = arith.addf %272, %276 : vector<4x16xf32>
    %278 = arith.divf %277, %275 : vector<4x16xf32>
    %c0_138 = arith.constant 0 : index
    %c0_139 = arith.constant 0 : index
    %279 = vector.load %arg14[%c0_138, %c0_139] : memref<8x4xbf16, #tpu.memory_space<vmem>>, vector<8x4xbf16>
    %280 = arith.truncf %278 : vector<4x16xf32> to vector<4x16xbf16>
    %cst_140 = arith.constant dense<0.000000e+00> : vector<8x16xf32>
    %281 = tpu.matmul %279, %280, %cst_140 {dimension_numbers = #tpu.dot_dimension_numbers<[1], [0], [0], [1], [0, 0, 1, 1], [], []>} : vector<8x4xbf16>, vector<4x16xbf16>, vector<8x16xf32> -> vector<8x16xf32>
    %c0_141 = arith.constant 0 : index
    %c0_142 = arith.constant 0 : index
    %282 = vector.load %arg15[%c0_141, %c0_142] : memref<8x1xf32, #tpu.memory_space<vmem>>, vector<8x1xf32>
    %283 = vector.broadcast %282 : vector<8x1xf32> to vector<8x16xf32>
    %284 = arith.addf %281, %283 : vector<8x16xf32>
    %285 = arith.addf %284, %1 : vector<8x16xf32>
    %c0_143 = arith.constant 0 : index
    %c0_144 = arith.constant 0 : index
    %c0_145 = arith.constant 0 : index
    %286 = vector.load %arg17[%c0_143, %c0_144, %c0_145] : memref<1x8x16xf32, #tpu.memory_space<vmem>>, vector<1x8x16xf32>
    %287 = vector.shape_cast %286 : vector<1x8x16xf32> to vector<8x16xf32>
    %288 = vector.shape_cast %285 : vector<8x16xf32> to vector<1x8x16xf32>
    tpu.vector_store %arg17[%c0_143, %c0_144, %c0_145], %288 {strides = array<i32>} : memref<1x8x16xf32, #tpu.memory_space<vmem>>, vector<1x8x16xf32>,
    return
  }
  func.func @transform_0(%arg0: i32, %arg1: i32) -> (i32, i32, i32) {
    %c0_i32 = arith.constant 0 : i32
    %c0_i32_0 = arith.constant 0 : i32
    return %arg0, %c0_i32, %arg1 : i32, i32, i32
  }
  func.func @transform_1(%arg0: i32, %arg1: i32) -> (i32, i32, i32, i32) {
    %c0_i32 = arith.constant 0 : i32
    %c0_i32_0 = arith.constant 0 : i32
    %c0_i32_1 = arith.constant 0 : i32
    return %arg0, %c0_i32, %c0_i32_0, %arg1 : i32, i32, i32, i32
  }
  func.func @transform_2(%arg0: i32, %arg1: i32) -> (i32, i32, i32) {
    %c0_i32 = arith.constant 0 : i32
    %c0_i32_0 = arith.constant 0 : i32
    return %arg0, %c0_i32, %arg1 : i32, i32, i32
  }
  func.func @transform_3(%arg0: i32, %arg1: i32) -> (i32, i32, i32, i32) {
    %c0_i32 = arith.constant 0 : i32
    %c0_i32_0 = arith.constant 0 : i32
    %c0_i32_1 = arith.constant 0 : i32
    return %arg0, %c0_i32, %c0_i32_0, %arg1 : i32, i32, i32, i32
  }
  func.func @transform_4(%arg0: i32, %arg1: i32) -> (i32, i32) {
    %c0_i32 = arith.constant 0 : i32
    %c0_i32_0 = arith.constant 0 : i32
    %c0_i32_1 = arith.constant 0 : i32
    return %c0_i32, %c0_i32_0 : i32, i32
  }
  func.func @transform_5(%arg0: i32, %arg1: i32) -> (i32, i32) {
    %c0_i32 = arith.constant 0 : i32
    %c0_i32_0 = arith.constant 0 : i32
    %c0_i32_1 = arith.constant 0 : i32
    return %c0_i32, %c0_i32_0 : i32, i32
  }
  func.func @transform_6(%arg0: i32, %arg1: i32) -> (i32, i32) {
    %c0_i32 = arith.constant 0 : i32
    %c0_i32_0 = arith.constant 0 : i32
    %c0_i32_1 = arith.constant 0 : i32
    return %c0_i32, %c0_i32_0 : i32, i32
  }
  func.func @transform_7(%arg0: i32, %arg1: i32) -> (i32, i32) {
    %c0_i32 = arith.constant 0 : i32
    %c0_i32_0 = arith.constant 0 : i32
    %c0_i32_1 = arith.constant 0 : i32
    return %c0_i32, %c0_i32_0 : i32, i32
  }
  func.func @transform_8(%arg0: i32, %arg1: i32) -> (i32, i32) {
    %c0_i32 = arith.constant 0 : i32
    %c0_i32_0 = arith.constant 0 : i32
    %c0_i32_1 = arith.constant 0 : i32
    return %c0_i32, %c0_i32_0 : i32, i32
  }
  func.func @transform_9(%arg0: i32, %arg1: i32) -> (i32, i32) {
    %c0_i32 = arith.constant 0 : i32
    %c0_i32_0 = arith.constant 0 : i32
    %c0_i32_1 = arith.constant 0 : i32
    return %c0_i32, %c0_i32_0 : i32, i32
  }
  func.func @transform_10(%arg0: i32, %arg1: i32) -> (i32, i32) {
    %c0_i32 = arith.constant 0 : i32
    %c0_i32_0 = arith.constant 0 : i32
    %c0_i32_1 = arith.constant 0 : i32
    return %c0_i32, %c0_i32_0 : i32, i32
  }
  func.func @transform_11(%arg0: i32, %arg1: i32) -> (i32, i32) {
    %c0_i32 = arith.constant 0 : i32
    %c0_i32_0 = arith.constant 0 : i32
    %c0_i32_1 = arith.constant 0 : i32
    return %c0_i32, %c0_i32_0 : i32, i32
  }
  func.func @transform_12(%arg0: i32, %arg1: i32) -> (i32, i32) {
    %c0_i32 = arith.constant 0 : i32
    %c0_i32_0 = arith.constant 0 : i32
    %c0_i32_1 = arith.constant 0 : i32
    return %c0_i32, %c0_i32_0 : i32, i32
  }
  func.func @transform_13(%arg0: i32, %arg1: i32) -> (i32, i32) {
    %c0_i32 = arith.constant 0 : i32
    %c0_i32_0 = arith.constant 0 : i32
    %c0_i32_1 = arith.constant 0 : i32
    return %c0_i32, %c0_i32_0 : i32, i32
  }
  func.func @transform_14(%arg0: i32, %arg1: i32) -> (i32, i32) {
    %c0_i32 = arith.constant 0 : i32
    %c0_i32_0 = arith.constant 0 : i32
    %c0_i32_1 = arith.constant 0 : i32
    return %c0_i32, %c0_i32_0 : i32, i32
  }
  func.func @transform_15(%arg0: i32, %arg1: i32) -> (i32, i32, i32) {
    %c0_i32 = arith.constant 0 : i32
    %c0_i32_0 = arith.constant 0 : i32
    return %arg0, %c0_i32, %arg1 : i32, i32, i32
  }
}

</mosaic_0001>

<bundles_post_ra>
// kernel: ptblock_forward.1
= control target key start
LH: loop header
LB: loop body
LE: loop exit
PB: predicated region body
PF: predicated region fallthrough
CT: control target
= control target key end

     0   :  { %s5392_s0 = inlined_call_operand.hbm [shape: f32[2,8,16], index: 0, kind: input, shape index: {}]   ;;  %s5393_s1 = inlined_call_operand.hbm [shape: bf16[2,8,8,16], index: 1, kind: input, shape index: {}]   ;;  %s5394_s2 = inlined_call_operand.hbm [shape: f32[2,3,16], index: 2, kind: input, shape index: {}]   ;;  %s5395_s3 = inlined_call_operand.hbm [shape: f32[2,8,3,16], index: 3, kind: input, shape index: {}]   ;;  %s5396_s4 = inlined_call_operand.hbm [shape: bf16[4,8], index: 4, kind: input, shape index: {}]   ;;  %s5397_s5 = inlined_call_operand.hbm [shape: bf16[8,8], index: 5, kind: input, shape index: {}]   ;;  %s5398_s6 = inlined_call_operand.hbm [shape: bf16[4,3], index: 6, kind: input, shape index: {}]   ;;  %s5399_s7 = inlined_call_operand.hbm [shape: f32[4,1], index: 7, kind: input, shape index: {}]   ;;  %s5400_s8 = inlined_call_operand.hbm [shape: bf16[4,4], index: 8, kind: input, shape index: {}]   ;;  %s5401_s9 = inlined_call_operand.hbm [shape: bf16[4,4], index: 9, kind: input, shape index: {}]   ;;  %s5402_s10 = inlined_call_operand.hbm [shape: f32[4,1], index: 10, kind: input, shape index: {}]   ;;  %s5403_s11 = inlined_call_operand.hbm [shape: bf16[4,4], index: 11, kind: input, shape index: {}]   ;;  %s5404_s12 = inlined_call_operand.hbm [shape: bf16[8,4], index: 12, kind: input, shape index: {}]   ;;  %s5405_s13 = inlined_call_operand.hbm [shape: f32[8,1], index: 13, kind: input, shape index: {}]   ;;  %s5406_s14 = inlined_call_operand.hbm [shape: f32[4,1], index: 14, kind: input, shape index: {}]   ;;  %s5407_s15 = inlined_call_operand.hbm [shape: f32[2,8,16], index: 15, kind: output, shape index: {}]  }
   0x1   :  { %5440 = sst [smem:[#allocation46_spill]] %s5392_s0 }
   0x2   :  { %5441 = sst [smem:[#allocation47_spill]] %s5393_s1 }
   0x3   :  { %5442 = sst [smem:[#allocation48_spill]] %s5394_s2 }
   0x4   :  { %5443 = sst [smem:[#allocation49_spill]] %s5396_s4 }
   0x5   :  { %5444 = sst [smem:[#allocation50_spill]] %s5397_s5 }
   0x6   :  { %5445 = sst [smem:[#allocation51_spill]] %s5399_s7 }
   0x7   :  { %5446 = sst [smem:[#allocation52_spill]] %s5401_s9 }
   0x8   :  { %5447 = sst [smem:[#allocation53_spill]] %s5403_s11 }
   0x9   :  { %5448 = sst [smem:[#allocation54_spill]] %s5404_s12 }
   0xa   :  { %5449 = sst [smem:[#allocation55_spill]] %s5405_s13 }
   0xb   :  { %5450 = sst [smem:[#allocation56_spill]] %s5406_s14 }
   0xc   :  { %5451 = sst [smem:[#allocation57_spill]] %s5407_s15 }
   0xd   :  { %20 = vsyncpa [#allocation3], 0 }
   0xe   :  { %22 = vsyncpa [#allocation3 + $0x1], 0 }
   0xf   :  { %23 = vsyncpa [#allocation6], 0 }
  0x10   :  { %25 = vsyncpa [#allocation6 + $0x1], 0 }
  0x11   :  { %26 = vsyncpa [#allocation9], 0 }
  0x12   :  { %28 = vsyncpa [#allocation9 + $0x1], 0 }
  0x13   :  { %29 = vsyncpa [#allocation12], 0 }
  0x14   :  { %30 = vsyncpa [#allocation15], 0 }
  0x15   :  { %31 = vsyncpa [#allocation18], 0 }
  0x16   :  { %32 = vsyncpa [#allocation21], 0 }
  0x17   :  { %33 = vsyncpa [#allocation24], 0 }
  0x18   :  { %34 = vsyncpa [#allocation4], 0 }
  0x19   :  { %36 = vsyncpa [#allocation4 + $0x1], 0  ;;  %s4456_s18 = smov 0   ;;  %s4458_s19 = smov 0  }
  0x1a   :  { %s4460_s20 = smov 0   ;;  %s4462_s21 = smov 0  }
  0x1b   :  { %s4464_s22 = smov 0   ;;  %s4466_s23 = smov 0  }
  0x1c LB: > { %5452 = sst [smem:[#allocation37_spill]] %s4332_s18  ;;  %s4487_s24 = sadd.s32 4294967295, %s4352_s23   ;;  %s4352_s23 = sphi %s4466_s23, %s42_s23   ;;  %s4348_s22 = sphi %s4464_s22, %s5523_s22   ;;  %s4344_s21 = sphi %s4462_s21, %s5522_s21   ;;  %s4340_s20 = sphi %s4460_s20, %s5518_s20   ;;  %s4336_s19 = sphi %s4458_s19, %s5521_s19   ;;  %s4332_s18 = sphi %s4456_s18, %s5520_s18  }
  0x1d   : > { %5453 = sst [smem:[#allocation38_spill]] %s4340_s20  ;;  %p3157_p0 = scmp.ge.s32.totalorder %s4352_s23, 1 }
  0x1e   : > { %5454 = sst [smem:[#allocation39_spill]] %s4344_s21  ;;  %p5412_p1 = scmp.eq.s32.totalorder %s4487_s24, 0 }
  0x1f   : > { %5455 = sst [smem:[#allocation40_spill]] %s4487_s24  ;;  %p430_p2 = scmp.lt.s32.totalorder %s4352_s23, 3 }
  0x20   : > { %s4354_s26 = smov [#allocation10]   ;;  %s4355_s28 = smov [#allocation11]  }
  0x21   : > { %p4492_p3 = pnand %p3157_p0, %p430_p2  ;;  %s443_s27 = sshll.u32 %s4354_s26, 4  ;;  %s444_s27 = int_to_ptr.vmem [resolvable:$true] %s443_s27 }
  0x22   : > { %s454_s29 = sshll.u32 %s4355_s28, 4  ;;  %s4356_s16 = smov [#allocation14]   ;;  %s4505_s29 = int_to_ptr.vmem [resolvable:$true] %s454_s29 }
  0x23   : > { %s5456_s25 = scalar_select %p4492_p3, 1, 0 }
  0x24   : > { %p3649_p5 = pneg %p4492_p3  ;;  %s476_s17 = sshll.u32 %s4356_s16, 4  ;;  %s4507_s17 = int_to_ptr.vmem [resolvable:$true] %s476_s17 }
  0x25   : > { %5457 = sst [smem:[#allocation41_spill]] %s5456_s25  ;;  %s5459_s4 = sld [smem:[#allocation49_spill]] }
  0x26   : > { %p4501_p6 = pnand %p3649_p5, %p5412_p1 }
  0x28   : > { %s5458_s30 = scalar_select %p4501_p6, 1, 0 }
  0x29   : > { %p4517_p8 = pneg %p4501_p6 }
  0x2b   : > { %s3810_s21 = scalar_lea.hbm %s5459_s4, 32 }
  0x2c   : > { %p3811_p7 = scmp.ne.s32.totalorder %s5459_s4, %s3810_s21  ;;  %p3817_p11 = scmp.lt.u32.totalorder %s3810_s21, %s5459_s4 }
  0x2d   : > { %s5460_s28 = scalar_select %p4517_p8, 1, 0 }
  0x2e   : > { %p3813_p9 = pnand %p4517_p8, %p3811_p7 }
  0x30   : > { %p3814_p10 = pneg %p3813_p9 }
  0x32   : > { %p3819_p12 = pnand %p3817_p11, %p3814_p10 }
  0x34   : > { %3822 = shalt.err (!%p3819_p12)
}
  0x35   : > { %s3823_s15 = scalar_lea.vmem %s444_s27, 32  ;;  %p3831_p5 = scmp.lt.s32.totalorder %s444_s27, %s444_s27 }
  0x36   : > { %p3824_p13 = scmp.ne.s32.totalorder %s444_s27, %s3823_s15  ;;  %p3832_p4 = scmp.lt.s32.totalorder %s3823_s15, %s3823_s15 }
  0x38   : > { %p3826_p0 = pnand %p3824_p13, %p4517_p8  ;;  %p3833_p1 = por %p3832_p4, %p3831_p5 }
  0x3a   : > { %p3827_p2 = pneg %p3826_p0 }
  0x3c   : > { %p3834_p3 = pnand %p3833_p1, %p3827_p2 }
  0x3e   : > { %3837 = shalt.err (!%p3834_p3)
}
  0x3f   : > { %3652 = dma.hbm_to_vmem [thread:$0]  (!%p4501_p6), %s5459_s4, 32, %s444_s27, [#allocation9]  }
  0x40   : > { %s5461_s5 = sld [smem:[#allocation50_spill]] }
  0x46   : > { %s3838_s26 = scalar_lea.hbm %s5461_s5, 64 }
  0x47   : > { %p3839_p7 = scmp.ne.s32.totalorder %s5461_s5, %s3838_s26  ;;  %p3845_p1 = scmp.lt.u32.totalorder %s3838_s26, %s5461_s5 }
  0x49   : > { %p3841_p9 = pnand %p3839_p7, %p4517_p8 }
  0x4b   : > { %p3842_p4 = pneg %p3841_p9 }
  0x4d   : > { %p3847_p3 = pnand %p3845_p1, %p3842_p4 }
  0x4f   : > { %3850 = shalt.err (!%p3847_p3)
}
  0x50   : > { %s3851_s27 = scalar_lea.vmem %s4505_s29, 64  ;;  %p3859_p13 = scmp.lt.s32.totalorder %s4505_s29, %s4505_s29 }
  0x51   : > { %p3852_p10 = scmp.ne.s32.totalorder %s4505_s29, %s3851_s27  ;;  %p3860_p0 = scmp.lt.s32.totalorder %s3851_s27, %s3851_s27 }
  0x53   : > { %p3854_p11 = pnand %p3852_p10, %p4517_p8  ;;  %p3861_p2 = por %p3860_p0, %p3859_p13 }
  0x55   : > { %p3855_p12 = pneg %p3854_p11 }
  0x57   : > { %p3862_p5 = pnand %p3861_p2, %p3855_p12 }
  0x59   : > { %3865 = shalt.err (!%p3862_p5)
}
  0x5a   : > { %3655 = dma.hbm_to_vmem [thread:$0]  (!%p4501_p6), %s5461_s5, 64, %s4505_s29, [#allocation12]  }
  0x5b   : > { %s5462_s7 = sld [smem:[#allocation51_spill]] }
  0x61   : > { %s3866_s0 = scalar_lea.hbm %s5462_s7, 64 }
  0x62   : > { %p3867_p7 = scmp.ne.s32.totalorder %s5462_s7, %s3866_s0  ;;  %p3873_p1 = scmp.lt.u32.totalorder %s3866_s0, %s5462_s7 }
  0x64   : > { %p3869_p9 = pnand %p3867_p7, %p4517_p8 }
  0x66   : > { %p3870_p4 = pneg %p3869_p9 }
  0x68   : > { %p3875_p3 = pnand %p3873_p1, %p3870_p4 }
  0x6a   : > { %3878 = shalt.err (!%p3875_p3)
}
  0x6b   : > { %s3879_s29 = scalar_lea.vmem %s4507_s17, 64  ;;  %p3887_p13 = scmp.lt.s32.totalorder %s4507_s17, %s4507_s17 }
  0x6c   : > { %p3880_p10 = scmp.ne.s32.totalorder %s4507_s17, %s3879_s29  ;;  %p3888_p0 = scmp.lt.s32.totalorder %s3879_s29, %s3879_s29 }
  0x6e   : > { %p3882_p11 = pnand %p3880_p10, %p4517_p8  ;;  %p3889_p2 = por %p3888_p0, %p3887_p13 }
  0x70   : > { %p3883_p12 = pneg %p3882_p11 }
  0x72   : > { %p3890_p5 = pnand %p3889_p2, %p3883_p12 }
  0x74   : > { %3893 = shalt.err (!%p3890_p5)
}
  0x75   : > { %3661 = dma.hbm_to_vmem [thread:$0]  (!%p4501_p6), %s5462_s7, 64, %s4507_s17, [#allocation15]  }
  0x76   : > { %s4357_s14 = smov [#allocation17]   ;;  %s4358_s25 = smov [#allocation20]  }
  0x77   : > { %s498_s2 = sshll.u32 %s4357_s14, 4  ;;  %s520_s0 = sshll.u32 %s4358_s25, 4  ;;  %s499_s2 = int_to_ptr.vmem [resolvable:$true] %s498_s2  ;;  %s521_s0 = int_to_ptr.vmem [resolvable:$true] %s520_s0 }
  0x78   : > { %s5463_s9 = sld [smem:[#allocation52_spill]] }
  0x7e   : > { %s3894_s16 = scalar_lea.hbm %s5463_s9, 32 }
  0x7f   : > { %p3895_p7 = scmp.ne.s32.totalorder %s5463_s9, %s3894_s16  ;;  %p3901_p1 = scmp.lt.u32.totalorder %s3894_s16, %s5463_s9 }
  0x81   : > { %p3897_p9 = pnand %p3895_p7, %p4517_p8 }
  0x83   : > { %p3898_p4 = pneg %p3897_p9 }
  0x85   : > { %p3903_p3 = pnand %p3901_p1, %p3898_p4 }
  0x87   : > { %3906 = shalt.err (!%p3903_p3)
}
  0x88   : > { %s3907_s17 = scalar_lea.vmem %s499_s2, 32  ;;  %p3915_p13 = scmp.lt.s32.totalorder %s499_s2, %s499_s2 }
  0x89   : > { %p3908_p10 = scmp.ne.s32.totalorder %s499_s2, %s3907_s17  ;;  %p3916_p0 = scmp.lt.s32.totalorder %s3907_s17, %s3907_s17 }
  0x8b   : > { %p3910_p11 = pnand %p3908_p10, %p4517_p8  ;;  %p3917_p2 = por %p3916_p0, %p3915_p13 }
  0x8d   : > { %p3911_p12 = pneg %p3910_p11 }
  0x8f   : > { %p3918_p5 = pnand %p3917_p2, %p3911_p12 }
  0x91   : > { %3921 = shalt.err (!%p3918_p5)
}
  0x92   : > { %3667 = dma.hbm_to_vmem [thread:$0]  (!%p4501_p6), %s5463_s9, 32, %s499_s2, [#allocation18]  }
  0x93   : > { %s5464_s11 = sld [smem:[#allocation53_spill]] }
  0x99   : > { %s3922_s21 = scalar_lea.hbm %s5464_s11, 32 }
  0x9a   : > { %p3923_p7 = scmp.ne.s32.totalorder %s5464_s11, %s3922_s21  ;;  %p3929_p1 = scmp.lt.u32.totalorder %s3922_s21, %s5464_s11 }
  0x9c   : > { %p3925_p9 = pnand %p3923_p7, %p4517_p8 }
  0x9e   : > { %p3926_p4 = pneg %p3925_p9 }
  0xa0   : > { %p3931_p3 = pnand %p3929_p1, %p3926_p4 }
  0xa2   : > { %3934 = shalt.err (!%p3931_p3)
}
  0xa3   : > { %s3935_s27 = scalar_lea.vmem %s521_s0, 32  ;;  %p3943_p13 = scmp.lt.s32.totalorder %s521_s0, %s521_s0 }
  0xa4   : > { %p3936_p10 = scmp.ne.s32.totalorder %s521_s0, %s3935_s27  ;;  %p3944_p0 = scmp.lt.s32.totalorder %s3935_s27, %s3935_s27 }
  0xa6   : > { %p3938_p11 = pnand %p3936_p10, %p4517_p8  ;;  %p3945_p2 = por %p3944_p0, %p3943_p13 }
  0xa8   : > { %p3939_p12 = pneg %p3938_p11 }
  0xaa   : > { %p3946_p5 = pnand %p3945_p2, %p3939_p12 }
  0xac   : > { %3949 = shalt.err (!%p3946_p5)
}
  0xad   : > { %3673 = dma.hbm_to_vmem [thread:$0]  (!%p4501_p6), %s5464_s11, 32, %s521_s0, [#allocation21]  }
  0xae   : > { %s4359_s12 = smov [#allocation23]   ;;  %s5465_s13 = sld [smem:[#allocation55_spill]] }
  0xaf   : > { %s542_s14 = sshll.u32 %s4359_s12, 4  ;;  %s543_s14 = int_to_ptr.vmem [resolvable:$true] %s542_s14 }
  0xb4   : > { %s3950_s21 = scalar_lea.hbm %s5465_s13, 128 }
  0xb5   : > { %p3951_p7 = scmp.ne.s32.totalorder %s5465_s13, %s3950_s21  ;;  %p3957_p1 = scmp.lt.u32.totalorder %s3950_s21, %s5465_s13 }
  0xb7   : > { %p3953_p9 = pnand %p3951_p7, %p4517_p8 }
  0xb9   : > { %p3954_p4 = pneg %p3953_p9 }
  0xbb   : > { %p3959_p3 = pnand %p3957_p1, %p3954_p4 }
  0xbd   : > { %3962 = shalt.err (!%p3959_p3)
}
  0xbe   : > { %s3963_s0 = scalar_lea.vmem %s543_s14, 128  ;;  %p3971_p13 = scmp.lt.s32.totalorder %s543_s14, %s543_s14 }
  0xbf   : > { %p3964_p10 = scmp.ne.s32.totalorder %s543_s14, %s3963_s0  ;;  %p3972_p0 = scmp.lt.s32.totalorder %s3963_s0, %s3963_s0 }
  0xc1   : > { %p3966_p11 = pnand %p3964_p10, %p4517_p8  ;;  %p3973_p2 = por %p3972_p0, %p3971_p13 }
  0xc3   : > { %p3967_p12 = pneg %p3966_p11 }
  0xc5   : > { %p3974_p5 = pnand %p3973_p2, %p3967_p12 }
  0xc7   : > { %3977 = shalt.err (!%p3974_p5)
}
  0xc8   : > { %3679 = dma.hbm_to_vmem [thread:$0]  (!%p4501_p6), %s5465_s13, 128, %s543_s14, [#allocation24]  }
  0xc9   : > { %s3156_s17 = sadd.s32 4294967294, %s4352_s23   ;;  %s54_s12 = sadd.s32 1, %s4348_s22 }
  0xca   : > { %p56_p7 = scmp.ge.s32.totalorder %s54_s12, 2  ;;  %s63_s4 = sadd.s32 1, %s4340_s20 }
  0xcb   : > { %p70_p9 = scmp.ne.s32.totalorder %s4340_s20, %s4336_s19  ;;  %p71_p4 = scmp.eq.s32.totalorder %s4352_s23, 0 }
  0xcc   : > { %s5525_s12 = smov (%p56_p7, %s54_s12), 0  ;;  %p76_p3 = scmp.ne.s32.totalorder %s4336_s19, %s4332_s18 }
  0xcd   : > { %5466 = sst [smem:[#allocation42_spill]] %s5525_s12  ;;  %p4641_p1 = por %p71_p4, %p70_p9 }
  0xce   : > { %s58_s14 = ssub.s32 %s4348_s22, %s5525_s12  ;;  %p417_p10 = scmp.eq.s32.totalorder %s4487_s24, 1 }
  0xcf   : > { %p61_p11 = scmp.eq.s32.totalorder %s58_s14, 0  ;;  %p5468_p12 = scmp.eq.s32.totalorder %s4487_s24, 0 }
  0xd0   : > { %p4656_p0 = por %p417_p10, %p70_p9  ;;  %p423_p2 = scmp.eq.s32.totalorder %s3156_s17, 1 }
  0xd1   : > { %p4652_p13 = por %p5468_p12, %p76_p3  ;;  %p3711_p7 = scmp.lt.s32.totalorder %s4352_s23, 2 }
  0xd2   : > { %s5470_s26 = scalar_select %p4656_p0, 1, 0 }
  0xd3   : > { %s5469_s21 = scalar_select %p4652_p13, 1, 0 }
  0xd4   : > { %5471 = sst [smem:[#allocation43_spill]] %s5470_s26  ;;  %p4663_p5 = por %p423_p2, %p76_p3 }
  0xd5   : > { %s4661_s16 = scalar_select %p61_p11, %s4340_s20, %s63_s4  }
  0xd6   : > { %s5473_s15 = scalar_select %p4663_p5, 1, 0 }
  0xd7   : > { %5472 = sst [smem:[#allocation44_spill]] %s4661_s16  ;;  %s4669_s29 = sand.u32 1, %s4340_s20  }
  0xd8   : > { %5474 = sst [smem:[#allocation45_spill]] %s5473_s15  ;;  %p4674_p4 = pnand %p3711_p7, %p4641_p1 }
  0xd9   : > { %s5416_s2 = sshll.u32 %s4669_s29, 5  ;;  %s5417_s17 = sshll.u32 %s4348_s22, 9 }
  0xda   : > { %s5475_s27 = scalar_select %p4674_p4, 1, 0 }
  0xdb   : > { %s5476_s1 = sld [smem:[#allocation47_spill]]  ;;  %s587_s0 = scalar_lea.vmem [#allocation5], %s5416_s2 }
  0xdc   : > { %s595_s25 = sshll.u32 %s587_s0, 4  ;;  %s5477_s7 = sand.u32 1, %s4352_s23   ;;  %s4689_s25 = int_to_ptr.vmem [resolvable:$true] %s595_s25 }
  0xdd   : > { %s4693_s9 = scalar_lea.sflag [#allocation6], %s5477_s7  ;;  %p4699_p1 = pneg %p4674_p4 }
  0xdf   : > { %s5478_s13 = scalar_select %p4699_p1, 1, 0 }
  0xe1   : > { %s4685_s5 = scalar_lea.hbm %s5476_s1, %s5417_s17  ;;  %s3983_s0 = scalar_lea.hbm %s5476_s1, 1024 }
  0xe2   : > { %s3978_s11 = scalar_lea.hbm %s4685_s5, 512  ;;  %p3984_p11 = scmp.lt.u32.totalorder %s4685_s5, %s5476_s1 }
  0xe3   : > { %p3979_p9 = scmp.ne.s32.totalorder %s4685_s5, %s3978_s11  ;;  %p3985_p12 = scmp.lt.u32.totalorder %s3983_s0, %s3978_s11 }
  0xe4   : > { %p3987_p7 = scmp.lt.u32.totalorder %s3978_s11, %s4685_s5 }
  0xe5   : > { %p3981_p3 = pnand %p4699_p1, %p3979_p9  ;;  %p3986_p2 = por %p3985_p12, %p3984_p11 }
  0xe7   : > { %p3982_p10 = pneg %p3981_p3  ;;  %p3988_p5 = por %p3987_p7, %p3986_p2 }
  0xe9   : > { %p3989_p0 = pnand %p3988_p5, %p3982_p10 }
  0xeb   : > { %3992 = shalt.err (!%p3989_p0)
}
  0xec   : > { %s3993_s7 = scalar_lea.vmem %s4689_s25, 512  ;;  %s4360_s4 = smov [#allocation5]  }
  0xed   : > { %p3994_p9 = scmp.ne.s32.totalorder %s4689_s25, %s3993_s7  ;;  %s3998_s14 = sshll.u32 %s4360_s4, 4  ;;  %s3999_s14 = int_to_ptr.vmem [resolvable:$false] %s3998_s14 }
  0xee   : > { %s4000_s2 = scalar_lea.vmem %s3999_s14, 1024  ;;  %p4001_p6 = scmp.lt.s32.totalorder %s4689_s25, %s3999_s14 }
  0xef   : > { %p3996_p3 = pnand %p3994_p9, %p4699_p1  ;;  %p4002_p8 = scmp.lt.s32.totalorder %s4000_s2, %s3993_s7 }
  0xf1   : > { %p3997_p13 = pneg %p3996_p3  ;;  %p4003_p11 = por %p4002_p8, %p4001_p6 }
  0xf3   : > { %p4004_p12 = pnand %p4003_p11, %p3997_p13 }
  0xf5   : > { %4007 = shalt.err (!%p4004_p12)
}
  0xf6   : > { %s5436_s11 = smov 64   ;;  %s5437_s17 = smov 4  }
  0xf7   : > { %3689 = dma.hbm_to_vmem [thread:$0]  (!%p4674_p4), %s4685_s5, 512, %s4689_s25, %s4693_s9, %s5436_s11, %s5436_s11, %s5437_s17  }
  0xf8   : > { %s5479_s0 = sshll.u32 %s4348_s22, 9  ;;  %s5480_s2 = sshll.u32 %s4669_s29, 5 }
  0xf9   : > { %s4731_s14 = scalar_lea.hbm %s5395_s3, %s5479_s0  ;;  %s628_s1 = scalar_lea.vmem [#allocation8], %s5480_s2 }
  0xfa   : > { %s636_s12 = sshll.u32 %s628_s1, 4  ;;  %s4363_s16 = smov [#allocation13]   ;;  %s4735_s12 = int_to_ptr.vmem [resolvable:$true] %s636_s12 }
  0xfb   : > { %s465_s20 = sshll.u32 %s4363_s16, 4  ;;  %s4008_s26 = scalar_lea.hbm %s5398_s6, 32  ;;  %s466_s20 = int_to_ptr.vmem [resolvable:$true] %s465_s20 }
  0xfc   : > { %p4009_p6 = scmp.ne.s32.totalorder %s5398_s6, %s4008_s26  ;;  %p5481_p8 = scmp.ne.s32.totalorder %s5460_s28, 0 }
  0xfd   : > { %p4015_p5 = scmp.lt.u32.totalorder %s4008_s26, %s5398_s6 }
  0xfe   : > { %p4011_p13 = pnand %p4009_p6, %p5481_p8 }
 0x100   : > { %p4012_p0 = pneg %p4011_p13 }
 0x102   : > { %p4017_p10 = pnand %p4015_p5, %p4012_p0 }
 0x104   : > { %4020 = shalt.err (!%p4017_p10)
}
 0x105   : > { %s4021_s1 = scalar_lea.vmem %s466_s20, 32  ;;  %p4029_p3 = scmp.lt.s32.totalorder %s466_s20, %s466_s20 }
 0x106   : > { %p4022_p2 = scmp.ne.s32.totalorder %s466_s20, %s4021_s1  ;;  %p4030_p11 = scmp.lt.s32.totalorder %s4021_s1, %s4021_s1 }
 0x108   : > { %p4024_p7 = pnand %p4022_p2, %p5481_p8  ;;  %p4031_p12 = por %p4030_p11, %p4029_p3 }
 0x10a   : > { %p4025_p9 = pneg %p4024_p7 }
 0x10c   : > { %p4032_p4 = pnand %p4031_p12, %p4025_p9 }
 0x10e   : > { %4035 = shalt.err (!%p4032_p4)
}
 0x10f   : > { %p5482_p6 = scmp.ne.s32.totalorder %s5458_s30, 0  ;;  %s4364_s26 = smov [#allocation16]  }
 0x110   : > { %s487_s16 = sshll.u32 %s4364_s26, 4  ;;  %s4365_s15 = smov [#allocation19]   ;;  %s488_s16 = int_to_ptr.vmem [resolvable:$true] %s487_s16 }
 0x111   : > { %3658 = dma.hbm_to_vmem [thread:$0]  (!%p5482_p6), %s5398_s6, 32, %s466_s20, [#allocation12]  }
 0x112   : > { %s509_s4 = sshll.u32 %s4365_s15, 4  ;;  %s4036_s5 = scalar_lea.hbm %s5400_s8, 32  ;;  %s510_s4 = int_to_ptr.vmem [resolvable:$true] %s509_s4 }
 0x113   : > { %p4037_p4 = scmp.ne.s32.totalorder %s5400_s8, %s4036_s5  ;;  %p4043_p5 = scmp.lt.u32.totalorder %s4036_s5, %s5400_s8 }
 0x115   : > { %p4039_p13 = pnand %p4037_p4, %p5481_p8 }
 0x117   : > { %p4040_p0 = pneg %p4039_p13 }
 0x119   : > { %p4045_p10 = pnand %p4043_p5, %p4040_p0 }
 0x11b   : > { %4048 = shalt.err (!%p4045_p10)
}
 0x11c   : > { %s4049_s20 = scalar_lea.vmem %s488_s16, 32  ;;  %p4057_p3 = scmp.lt.s32.totalorder %s488_s16, %s488_s16 }
 0x11d   : > { %p4050_p2 = scmp.ne.s32.totalorder %s488_s16, %s4049_s20  ;;  %p4058_p11 = scmp.lt.s32.totalorder %s4049_s20, %s4049_s20 }
 0x11f   : > { %p4052_p7 = pnand %p4050_p2, %p5481_p8  ;;  %p4059_p12 = por %p4058_p11, %p4057_p3 }
 0x121   : > { %p4053_p9 = pneg %p4052_p7 }
 0x123   : > { %p4060_p1 = pnand %p4059_p12, %p4053_p9 }
 0x125   : > { %4063 = shalt.err (!%p4060_p1)
}
 0x126   : > { %3664 = dma.hbm_to_vmem [thread:$0]  (!%p5482_p6), %s5400_s8, 32, %s488_s16, [#allocation15]  }
 0x127   : > { %s4064_s2 = scalar_lea.hbm %s5402_s10, 64 }
 0x128   : > { %p4065_p4 = scmp.ne.s32.totalorder %s5402_s10, %s4064_s2  ;;  %p4071_p1 = scmp.lt.u32.totalorder %s4064_s2, %s5402_s10 }
 0x12a   : > { %p4067_p13 = pnand %p4065_p4, %p5481_p8 }
 0x12c   : > { %p4068_p0 = pneg %p4067_p13 }
 0x12e   : > { %p4073_p5 = pnand %p4071_p1, %p4068_p0 }
 0x130   : > { %4076 = shalt.err (!%p4073_p5)
}
 0x131   : > { %s4077_s18 = scalar_lea.vmem %s510_s4, 64  ;;  %p4085_p9 = scmp.lt.s32.totalorder %s510_s4, %s510_s4 }
 0x132   : > { %p4078_p10 = scmp.ne.s32.totalorder %s510_s4, %s4077_s18  ;;  %p4086_p3 = scmp.lt.s32.totalorder %s4077_s18, %s4077_s18 }
 0x134   : > { %p4080_p2 = pnand %p4078_p10, %p5481_p8  ;;  %p4087_p11 = por %p4086_p3, %p4085_p9 }
 0x136   : > { %p4081_p7 = pneg %p4080_p2 }
 0x138   : > { %p4088_p12 = pnand %p4087_p11, %p4081_p7 }
 0x13a   : > { %4091 = shalt.err (!%p4088_p12)
}
 0x13b   : > { %3670 = dma.hbm_to_vmem [thread:$0]  (!%p5482_p6), %s5402_s10, 64, %s510_s4, [#allocation18]  }
 0x13c   : > { %s4366_s24 = smov [#allocation22]   ;;  %s4367_s15 = smov [#allocation25]  }
 0x13d   : > { %s531_s26 = sshll.u32 %s4366_s24, 4  ;;  %s553_s7 = sshll.u32 %s4367_s15, 4  ;;  %s532_s26 = int_to_ptr.vmem [resolvable:$true] %s531_s26  ;;  %s554_s7 = int_to_ptr.vmem [resolvable:$true] %s553_s7 }
 0x13e   : > { %s5483_s25 = sld [smem:[#allocation54_spill]] }
 0x144   : > { %s4092_s0 = scalar_lea.hbm %s5483_s25, 64 }
 0x145   : > { %p4093_p4 = scmp.ne.s32.totalorder %s5483_s25, %s4092_s0  ;;  %p4099_p1 = scmp.lt.u32.totalorder %s4092_s0, %s5483_s25 }
 0x147   : > { %p4095_p13 = pnand %p4093_p4, %p5481_p8 }
 0x149   : > { %p4096_p0 = pneg %p4095_p13 }
 0x14b   : > { %p4101_p5 = pnand %p4099_p1, %p4096_p0 }
 0x14d   : > { %4104 = shalt.err (!%p4101_p5)
}
 0x14e   : > { %s4105_s4 = scalar_lea.vmem %s532_s26, 64  ;;  %p4113_p9 = scmp.lt.s32.totalorder %s532_s26, %s532_s26 }
 0x14f   : > { %p4106_p10 = scmp.ne.s32.totalorder %s532_s26, %s4105_s4  ;;  %p4114_p3 = scmp.lt.s32.totalorder %s4105_s4, %s4105_s4 }
 0x151   : > { %p4108_p2 = pnand %p4106_p10, %p5481_p8  ;;  %p4115_p11 = por %p4114_p3, %p4113_p9 }
 0x153   : > { %p4109_p7 = pneg %p4108_p2 }
 0x155   : > { %p4116_p12 = pnand %p4115_p11, %p4109_p7 }
 0x157   : > { %4119 = shalt.err (!%p4116_p12)
}
 0x158   : > { %3676 = dma.hbm_to_vmem [thread:$0]  (!%p5482_p6), %s5483_s25, 64, %s532_s26, [#allocation21]  }
 0x159   : > { %s5484_s2 = sld [smem:[#allocation56_spill]] }
 0x15f   : > { %s4120_s5 = scalar_lea.hbm %s5484_s2, 64 }
 0x160   : > { %p4121_p4 = scmp.ne.s32.totalorder %s5484_s2, %s4120_s5  ;;  %p4127_p1 = scmp.lt.u32.totalorder %s4120_s5, %s5484_s2 }
 0x162   : > { %p4123_p13 = pnand %p4121_p4, %p5481_p8 }
 0x164   : > { %p4124_p0 = pneg %p4123_p13 }
 0x166   : > { %p4129_p5 = pnand %p4127_p1, %p4124_p0 }
 0x168   : > { %4132 = shalt.err (!%p4129_p5)
}
 0x169   : > { %s4133_s4 = scalar_lea.vmem %s554_s7, 64  ;;  %p4141_p9 = scmp.lt.s32.totalorder %s554_s7, %s554_s7 }
 0x16a   : > { %p4134_p10 = scmp.ne.s32.totalorder %s554_s7, %s4133_s4  ;;  %p4142_p3 = scmp.lt.s32.totalorder %s4133_s4, %s4133_s4 }
 0x16c   : > { %p4136_p2 = pnand %p4134_p10, %p5481_p8  ;;  %p4143_p11 = por %p4142_p3, %p4141_p9 }
 0x16e   : > { %p4137_p7 = pneg %p4136_p2 }
 0x170   : > { %p4144_p12 = pnand %p4143_p11, %p4137_p7 }
 0x172   : > { %4147 = shalt.err (!%p4144_p12)
}
 0x173   : > { %3682 = dma.hbm_to_vmem [thread:$0]  (!%p5482_p6), %s5484_s2, 64, %s554_s7, [#allocation24]  }
 0x174   : > { %s3170_s24 = sshll.u32 %s4669_s29, 3  ;;  %s3171_s28 = sshll.u32 %s4348_s22, 7 }
 0x175   : > { %s5485_s5 = sld [smem:[#allocation46_spill]]  ;;  %s568_s30 = scalar_lea.vmem [#allocation2], %s3170_s24 }
 0x176   : > { %s576_s1 = sshll.u32 %s568_s30, 4  ;;  %s3175_s18 = sshll.u32 %s4669_s29, 2  ;;  %s577_s1 = int_to_ptr.vmem [resolvable:$true] %s576_s1 }
 0x177   : > { %s565_s16 = scalar_lea.sflag [#allocation3], %s4669_s29  ;;  %p5486_p4 = scmp.ne.s32.totalorder %s5478_s13, 0 }
 0x17b   : > { %s4832_s0 = scalar_lea.hbm %s5485_s5, %s3171_s28  ;;  %s4153_s20 = scalar_lea.hbm %s5485_s5, 256 }
 0x17c   : > { %s4148_s4 = scalar_lea.hbm %s4832_s0, 128  ;;  %p4154_p0 = scmp.lt.u32.totalorder %s4832_s0, %s5485_s5 }
 0x17d   : > { %p4149_p8 = scmp.ne.s32.totalorder %s4832_s0, %s4148_s4  ;;  %p4155_p1 = scmp.lt.u32.totalorder %s4153_s20, %s4148_s4 }
 0x17e   : > { %p4157_p10 = scmp.lt.u32.totalorder %s4148_s4, %s4832_s0 }
 0x17f   : > { %p4151_p6 = pnand %p4149_p8, %p5486_p4  ;;  %p4156_p5 = por %p4155_p1, %p4154_p0 }
 0x181   : > { %p4152_p13 = pneg %p4151_p6  ;;  %p4158_p2 = por %p4157_p10, %p4156_p5 }
 0x183   : > { %p4159_p7 = pnand %p4158_p2, %p4152_p13 }
 0x185   : > { %4162 = shalt.err (!%p4159_p7)
}
 0x186   : > { %s4163_s24 = scalar_lea.vmem %s577_s1, 128  ;;  %s4368_s15 = smov [#allocation2]  }
 0x187   : > { %p4164_p9 = scmp.ne.s32.totalorder %s577_s1, %s4163_s24  ;;  %s4168_s30 = sshll.u32 %s4368_s15, 4  ;;  %s4169_s30 = int_to_ptr.vmem [resolvable:$false] %s4168_s30 }
 0x188   : > { %s4170_s7 = scalar_lea.vmem %s4169_s30, 256  ;;  %p4171_p12 = scmp.lt.s32.totalorder %s577_s1, %s4169_s30 }
 0x189   : > { %p4166_p3 = pnand %p4164_p9, %p5486_p4  ;;  %p4172_p8 = scmp.lt.s32.totalorder %s4170_s7, %s4163_s24 }
 0x18b   : > { %p4167_p11 = pneg %p4166_p3  ;;  %p4173_p6 = por %p4172_p8, %p4171_p12 }
 0x18d   : > { %p4174_p0 = pnand %p4173_p6, %p4167_p11 }
 0x18f   : > { %4177 = shalt.err (!%p4174_p0)
}
 0x190   : > { %p5487_p1 = scmp.ne.s32.totalorder %s5475_s27, 0  ;;  %s3176_s4 = sshll.u32 %s4348_s22, 6 }
 0x191   : > { %s609_s26 = scalar_lea.vmem [#allocation7], %s3175_s18  ;;  %s5488_s15 = sld [smem:[#allocation48_spill]] }
 0x192   : > { %3686 = dma.hbm_to_vmem [thread:$0]  (!%p5487_p1), %s4832_s0, 128, %s577_s1, %s565_s16  }
 0x193   : > { %s617_s20 = sshll.u32 %s609_s26, 4  ;;  %s618_s20 = int_to_ptr.vmem [resolvable:$true] %s617_s20 }
 0x197   : > { %s615_s17 = scalar_lea.hbm %s5488_s15, %s3176_s4  ;;  %s4183_s2 = scalar_lea.hbm %s5488_s15, 128 }
 0x198   : > { %s4178_s24 = scalar_lea.hbm %s615_s17, 64  ;;  %p4184_p2 = scmp.lt.u32.totalorder %s615_s17, %s5488_s15 }
 0x199   : > { %p4179_p13 = scmp.ne.s32.totalorder %s615_s17, %s4178_s24  ;;  %p4185_p7 = scmp.lt.u32.totalorder %s4183_s2, %s4178_s24 }
 0x19a   : > { %p4187_p3 = scmp.lt.u32.totalorder %s4178_s24, %s615_s17 }
 0x19b   : > { %p4181_p5 = pnand %p4179_p13, %p5486_p4  ;;  %p4186_p9 = por %p4185_p7, %p4184_p2 }
 0x19d   : > { %p4182_p10 = pneg %p4181_p5  ;;  %p4188_p11 = por %p4187_p3, %p4186_p9 }
 0x19f   : > { %p4189_p12 = pnand %p4188_p11, %p4182_p10 }
 0x1a1   : > { %4192 = shalt.err (!%p4189_p12)
}
 0x1a2   : > { %s4193_s29 = scalar_lea.vmem %s618_s20, 64  ;;  %s4369_s1 = smov [#allocation7]  }
 0x1a3   : > { %p4194_p8 = scmp.ne.s32.totalorder %s618_s20, %s4193_s29  ;;  %s4198_s18 = sshll.u32 %s4369_s1, 4  ;;  %s4199_s18 = int_to_ptr.vmem [resolvable:$false] %s4198_s18 }
 0x1a4   : > { %s4200_s16 = scalar_lea.vmem %s4199_s18, 128  ;;  %p4201_p13 = scmp.lt.s32.totalorder %s618_s20, %s4199_s18 }
 0x1a5   : > { %p4196_p6 = pnand %p4194_p8, %p5486_p4  ;;  %p4202_p5 = scmp.lt.s32.totalorder %s4200_s16, %s4193_s29 }
 0x1a7   : > { %p4197_p0 = pneg %p4196_p6  ;;  %p4203_p1 = por %p4202_p5, %p4201_p13 }
 0x1a9   : > { %p4204_p2 = pnand %p4203_p1, %p4197_p0 }
 0x1ab   : > { %4207 = shalt.err (!%p4204_p2)
}
 0x1ac   : > { %p5489_p7 = scmp.ne.s32.totalorder %s5475_s27, 0  ;;  %s5490_s2 = sand.u32 1, %s4352_s23  }
 0x1ad   : > { %s4874_s5 = scalar_lea.sflag [#allocation9], %s5490_s2  ;;  %s4208_s4 = scalar_lea.hbm %s4731_s14, 512 }
 0x1ae   : > { %3692 = dma.hbm_to_vmem [thread:$0]  (!%p5489_p7), %s615_s17, 64, %s618_s20, %s4693_s9  }
 0x1af   : > { %p4209_p10 = scmp.ne.s32.totalorder %s4731_s14, %s4208_s4  ;;  %s4213_s11 = scalar_lea.hbm %s5395_s3, 1024 }
 0x1b0   : > { %p4214_p1 = scmp.lt.u32.totalorder %s4731_s14, %s5395_s3  ;;  %p4215_p11 = scmp.lt.u32.totalorder %s4213_s11, %s4208_s4 }
 0x1b1   : > { %p4211_p9 = pnand %p4209_p10, %p5486_p4  ;;  %p4217_p8 = scmp.lt.u32.totalorder %s4208_s4, %s4731_s14 }
 0x1b2   : > { %p4216_p12 = por %p4215_p11, %p4214_p1 }
 0x1b3   : > { %p4212_p3 = pneg %p4211_p9 }
 0x1b4   : > { %p4218_p6 = por %p4217_p8, %p4216_p12 }
 0x1b6   : > { %p4219_p0 = pnand %p4218_p6, %p4212_p3 }
 0x1b8   : > { %4222 = shalt.err (!%p4219_p0)
}
 0x1b9   : > { %s4223_s9 = scalar_lea.vmem %s4735_s12, 512  ;;  %s4370_s17 = smov [#allocation8]  }
 0x1ba   : > { %p4224_p13 = scmp.ne.s32.totalorder %s4735_s12, %s4223_s9  ;;  %s4228_s20 = sshll.u32 %s4370_s17, 4  ;;  %s4229_s20 = int_to_ptr.vmem [resolvable:$false] %s4228_s20 }
 0x1bb   : > { %s4230_s7 = scalar_lea.vmem %s4229_s20, 1024  ;;  %p4231_p10 = scmp.lt.s32.totalorder %s4735_s12, %s4229_s20 }
 0x1bc   : > { %p4226_p5 = pnand %p4224_p13, %p5486_p4  ;;  %p4232_p9 = scmp.lt.s32.totalorder %s4230_s7, %s4223_s9 }
 0x1be   : > { %p4227_p2 = pneg %p4226_p5  ;;  %p4233_p1 = por %p4232_p9, %p4231_p10 }
 0x1c0   : > { %p4234_p11 = pnand %p4233_p1, %p4227_p2 }
 0x1c2   : > { %4237 = shalt.err (!%p4234_p11)
}
 0x1c3   : > { %s5491_s0 = smov 4   ;;  %s5492_s29 = smov 64  }
 0x1c4   : > { %3695 = dma.hbm_to_vmem [thread:$0]  (!%p5489_p7), %s4731_s14, 512, %s4735_s12, %s4874_s5, %s5492_s29, %s5492_s29, %s5491_s0  }
 0x1c5   : > { %s5493_s13 = sld [smem:[#allocation41_spill]] }
 0x1cb   : > { %p5494_p4 = scmp.ne.s32.totalorder %s5493_s13, 0 }
 0x1cc   : > { %s4904_s1 = sand.u32 (!%p5494_p4), 1, %s4336_s19   ;;  %p5495_p3 = scmp.ne.s32.totalorder (!%p5494_p4), %s5469_s21, 0 }
 0x1cd   : > { %648 = sbr.rel (%p5494_p4) target bundleno = 6377 (0x18e9), region = 80  ;;  %s3181_s18 = sshll.u32 (!%p5494_p4), %s4904_s1, 3 }
 0x1ce   : > { %s651_s16 = scalar_lea.sflag (!%p5494_p4), [#allocation3], %s4904_s1  ;;  %s4910_s27 = scalar_lea.vmem (!%p5494_p4), [#allocation2], %s3181_s18 }
 0x1d4   : > { %4291 = dma.done.wait (%p5495_p3), %s651_s16, 128  }
 0x1d5   : > { %4293 = vsyncadd (%p5495_p3), %s651_s16, 4294967168  ;;  %s5496_s12 = sld [smem:[#allocation40_spill]]  ;;  %s3182_s2 = sshll.u32 %s4904_s1, 5 }
 0x1d6   : > { %s4918_s4 = scalar_lea.vmem [#allocation5], %s3182_s2 }
 0x1db   : > { %s659_s14 = sand.u32 1, %s5496_s12  }
 0x1dc   : > { %s660_s5 = scalar_lea.sflag [#allocation6], %s659_s14 }
 0x1dd   : > { %4295 = dma.done.wait (%p5495_p3), %s660_s5, 576  }
 0x1de   : > { %4297 = vsyncadd (%p5495_p3), %s660_s5, 4294966720  ;;  %s3183_s26 = sshll.u32 %s4904_s1, 2  ;;  %s678_s11 = scalar_lea.sflag [#allocation9], %s659_s14 }
 0x1df   : > { %s4925_s28 = scalar_lea.vmem [#allocation7], %s3183_s26  ;;  %s4927_s24 = scalar_lea.vmem [#allocation8], %s3182_s2 }
 0x1e0   : > { %4299 = dma.done.wait (%p5495_p3), %s678_s11, 512  }
 0x1e1   : > { %4301 = vsyncadd (%p5495_p3), %s678_s11, 4294966784  ;;  %p5497_p7 = scmp.eq.s32.totalorder %s5496_s12, 0 }
 0x1e3   : > { %4303 = dma.done.wait (%p5497_p7), [#allocation9], 32   ;;  %p5498_p12 = pmov %p5497_p7 }
 0x1e4   : > { %p5499_p8 = pmov %p5497_p7 }
 0x1e5   : > { %4305 = vsyncadd (%p5498_p12), [#allocation9], 4294967264 }
 0x1e6   : > { %4307 = dma.done.wait (%p5499_p8), [#allocation12], 96   ;;  %p5500_p6 = pmov %p5497_p7 }
 0x1e8   : > { %4309 = vsyncadd (%p5500_p6), [#allocation12], 4294967200  ;;  %p5501_p0 = pmov %p5500_p6 }
 0x1ea   : > { %4311 = dma.done.wait (%p5501_p0), [#allocation15], 96   ;;  %p5502_p13 = pmov %p5501_p0 }
 0x1eb   : > { %p5503_p5 = pmov %p5501_p0 }
 0x1ec   : > { %4313 = vsyncadd (%p5502_p13), [#allocation15], 4294967200 }
 0x1ed   : > { %4315 = dma.done.wait (%p5503_p5), [#allocation18], 96   ;;  %p5504_p2 = pmov %p5501_p0 }
 0x1ee   : > { %p5505_p10 = pmov %p5501_p0 }
 0x1ef   : > { %4317 = vsyncadd (%p5504_p2), [#allocation18], 4294967200 }
 0x1f0   : > { %4319 = dma.done.wait (%p5505_p10), [#allocation21], 96   ;;  %p5506_p9 = pmov %p5501_p0 }
 0x1f1   : > { %p5507_p1 = pmov %p5501_p0 }
 0x1f2   : > { %4321 = vsyncadd (%p5506_p9), [#allocation21], 4294967200 }
 0x1f3   : > { %4323 = dma.done.wait (%p5507_p1), [#allocation24], 192   ;;  %p5508_p11 = pmov %p5501_p0 }
 0x1f4   : > { %v4371_v0 = vmov 0.0   ;;  %vm4372_vm0 = vmmov 0   ;;  %v4373_v1 = vmov 0   ;;  %vm796_vm1 = vcmask 1043456   ;;  %v788_v2 = vld [vmem:[%s4910_s27] sm:$0xff]  ;;  %s5509_s21 = sld [smem:[#allocation39_spill]] }
 0x1f5   : > { %4325 = vsyncadd (%p5508_p11), [#allocation24], 4294967104  ;;  %3343 = vmatprep.subr.bf16.mxu0 %v4371_v0  ;;  %3349 = vmatprep.subr.bf16.mxu1 %v4371_v0  ;;  %vm916_vm2 = vcmask 1040384   ;;  %v862_v3 = vld [vmem:[%s4918_s4] sm:$0xf]  ;;  %vm792_vm3 = vcmask 64512   ;;  %v791_v4 = vpack.c.bf16 %v788_v2, %v788_v2 }
 0x1f6   : > { %3345 = vmatprep.mubr.msk.bf16.mxu0 %vm4372_vm0, %v4371_v0  ;;  %3351 = vmatprep.mubr.msk.bf16.mxu1 %vm4372_vm0, %v4371_v0  ;;  %v867_v5 = vsel %vm796_vm1, %v862_v3, 0  ;;  %v4967_v6 = vld [vmem:[%s4925_s28] sm:$0x7]  ;;  %vm917_vm4 = vcmask 1041408   ;;  %v4374_v7 = vmov 65535   ;;  %vm912_vm5 = vcmask 23552  }
 0x1f7   : > { %3789 = vset.pattern.permute.xlu0 %v4373_v1  ;;  %3790 = vset.pattern.permute.xlu1 %v4373_v1  ;;  %v918_v8 = vsel %vm916_vm2, 4294967295, %v4374_v7  ;;  %v4969_v9 = vld [vmem:[#allocation11] sm:$0xf]  ;;  %v845_v11 = vld [vmem:[#allocation14] sm:$0xf]  ;;  %v798_v12 = vsel %vm796_vm1, %v791_v4, 0 }
 0x1f8   : > { %3350 = vmatpush3.bf16.msra.mxu1 %v867_v5  ;;  %v909_v10 = vld [vmem:[%s4927_s24] sm:$0x7]  ;;  %848 = vperm.xlu0 %3789, %v845_v11   ;;  %v4976_v15 = vsel %vm917_vm4, %v918_v8, 0  ;;  %v851_v16 = vld [vmem:[#allocation19] sm:$0xf]  ;;  %vm965_vm6 = vcmask 31744  }
 0x1f9   : > { %v910_v13 = vsub.f32 %v4967_v6, %v909_v10  ;;  %3361 = vmatprep.subr.bf16.mxu1 %v4371_v0  ;;  %3344 = vmatpush3.bf16.msra.mxu0 %v798_v12  ;;  %v790_v14 = vld [vmem:[#allocation10] sm:$0x3]  ;;  %v4988_v19 = vld [vmem:[#allocation13] sm:$0x3]  ;;  %v857_v20 = vld [vmem:[#allocation25] sm:$0xf] }
 0x1fa   : > { %3355 = vmatprep.subr.bf16.mxu0 %v4371_v0  ;;  %860 = vperm.xlu1 %3790, %v857_v20   ;;  %v5001_v39 = vld [vmem:[#allocation16] sm:$0x3]  ;;  %v3203_v48 = vld [vmem:[%s4918_s4 + $0x4] sm:$0xf]  ;;  %v5012_v50 = vld [vmem:[#allocation17] sm:$0x3] }
 0x1fb   : > { %3352 = vmatmul.mubr.msk.bf16.vlgmr.msra.gmra.mrb[0].mxu1 %vm792_vm3, %v4969_v9  ;;  %v911_v17 = vpack.c.bf16 %v910_v13, %v910_v13  ;;  %v1119_v51 = vsel %vm796_vm1, %v3203_v48, 0  ;;  %v3205_v52 = vld [vmem:[%s4927_s24 + $0x4] sm:$0x7]  ;;  %v5031_v2 = vld [vmem:[#allocation20] sm:$0x3]  ;;  %s3254_s30 = sshll.u32 %s5509_s21, 7 }
 0x1fc   : > { %3363 = vmatprep.mubr.msk.bf16.mxu1 %vm4372_vm0, %v4371_v0  ;;  %3346 = vmatmul.mubr.msk.bf16.vlgmr.msra.gmra.mrb[0].mxu0 %vm792_vm3, %v790_v14  ;;  %v1163_v55 = vsub.f32 %v4967_v6, %v3205_v52  ;;  %s5510_s9 = sld [smem:[#allocation43_spill]]  ;;  %s786_s17 = scalar_lea.vmem [#allocation26], %s3181_s18  ;;  %vm2883_vm7 = vcmask 130048  }
 0x1fd   : > { %v921_v18 = vand.u32 %v4976_v15, %v911_v17  ;;  %854 = vperm.xlu0 %3789, %v851_v16   ;;  %3357 = vmatprep.mubr.msk.bf16.mxu0 %vm4372_vm0, %v4371_v0  ;;  %s2900_s20 = sshll.u32 %s786_s17, 4  ;;  %s5511_s29 = sld [smem:[#allocation57_spill]]  ;;  %s5345_s20 = int_to_ptr.vmem [resolvable:$true] %s2900_s20 }
 0x1fe   : > { %v1164_v61 = vpack.c.bf16 %v1163_v55, %v1163_v55  ;;  %s2886_s18 = scalar_lea.sflag [#allocation4], %s4904_s1  ;;  %s4238_s16 = scalar_lea.vmem %s5345_s20, 128 }
 0x1ff   : > { %3356 = vmatpush3.bf16.msra.mxu0 %v921_v18  ;;  %p4239_p4 = scmp.ne.s32.totalorder %s5345_s20, %s4238_s16 }
 0x200   : > { %3367 = vmatprep.subr.bf16.mxu0 %v4371_v0  ;;  %v1166_v3 = vand.u32 %v1164_v61, %v4976_v15 }
 0x202   : > { %p5512_p3 = scmp.ne.s32.totalorder %s5510_s9, 0 }
 0x203   : > { %s5343_s13 = scalar_lea.hbm %s5511_s29, %s3254_s30 }
 0x204   : > { %3358 = vmatmul.mubr.msk.bf16.vlgmr.msra.gmra.mrb[4].mxu0 %vm912_vm5, %v4988_v19  ;;  %p4240_p7 = pnand %p4239_p4, %p5512_p3 }
 0x205   : > { %3369 = vmatprep.mubr.msk.bf16.mxu0 %vm4372_vm0, %v4371_v0 }
 0x206   : > { %p4241_p12 = pneg %p4240_p7 }
 0x277   : > { %v4997_v30 = vpop.permute.xlu0 %848 }
 0x27c   : > { %v5026_v53 = vpop.permute.xlu0 %854 }
 0x2ce   : > { %v903_v21 = vpop.f32.mrb[0].mxu1 }
 0x2cf   : > { %v3353_v22 = vpop.f32.mrb[1].mxu1  ;;  %v4994_v23 = vpop.f32.mrb[0].mxu0 }
 0x2d0   : > { %v906_v24 = vpop.f32.mrb[2].mxu1  ;;  %v1012_v25 = vsub.f32 %v4994_v23, %v903_v21  ;;  %v3347_v26 = vpop.f32.mrb[1].mxu0 }
 0x2d1   : > { %v3354_v27 = vpop.f32.mrb[3].mxu1  ;;  %v837_v28 = vpop.f32.mrb[2].mxu0 }
 0x2d2   : > { %v3348_v29 = vpop.f32.mrb[3].mxu0 }
 0x2d7   : > { %v957_v31 = vpop.f32.mrb[4].mxu0 }
 0x2d8   : > { %v958_v32 = vadd.f32 %v957_v31, %v4997_v30  ;;  %v3359_v33 = vpop.f32.mrb[5].mxu0 }
 0x2d9   : > { %v960_v34 = vpop.f32.mrb[6].mxu0 }
 0x2da   : > { %v963_v35 = vmax.f32 %v958_v32, 0.0  ;;  %v3360_v36 = vpop.f32.mrb[7].mxu0  ;;  %v3210_v34 = vld [vmem:[%s4918_s4 + $0x8] sm:$0xf] }
 0x2db   : > { %v1352_v36 = vsel %vm796_vm1, %v3210_v34, 0 }
 0x2dc   : > { %v964_v37 = vpack.c.bf16 %v963_v35, %v963_v35 }
 0x2de   : > { %v970_v38 = vsel %vm917_vm4, %v964_v37, 0  ;;  %v3212_v37 = vld [vmem:[%s4927_s24 + $0x8] sm:$0x7] }
 0x2df   : > { %3362 = vmatpush3.bf16.msra.mxu1 %v970_v38 }
 0x2e0   : > { %3373 = vmatprep.subr.bf16.mxu1 %v4371_v0 }
 0x2e2   : > { %3364 = vmatmul.mubr.msk.bf16.vlgmr.msra.gmra.mrb[4].mxu1 %vm965_vm6, %v5001_v39 }
 0x2e3   : > { %3375 = vmatprep.mubr.msk.bf16.mxu1 %vm4372_vm0, %v4371_v0 }
 0x3b5   : > { %v1006_v40 = vpop.f32.mrb[4].mxu1 }
 0x3b6   : > { %v1013_v41 = vadd.f32 %v1012_v25, %v1006_v40  ;;  %v1110_v42 = vrot.slane %v1006_v40, 4  ;;  %v3365_v43 = vpop.f32.mrb[5].mxu1  ;;  %v1396_v40 = vsub.f32 %v4967_v6, %v3212_v37 }
 0x3b7   : > { %v1009_v44 = vpop.f32.mrb[6].mxu1 }
 0x3b8   : > { %v1014_v45 = vpack.c.bf16 %v1013_v41, %v1013_v41  ;;  %v5008_v46 = vadd.f32 %v1110_v42, %v903_v21  ;;  %v3366_v47 = vpop.f32.mrb[7].mxu1 }
 0x3b9   : > { %v1397_v47 = vpack.c.bf16 %v1396_v40, %v1396_v40 }
 0x3ba   : > { %v1019_v49 = vsel %vm917_vm4, %v1014_v45, 0 }
 0x3bb   : > { %3368 = vmatpush3.bf16.msra.mxu0 %v1019_v49  ;;  %v1399_v52 = vand.u32 %v1397_v47, %v4976_v15 }
 0x3bc   : > { %3379 = vmatprep.subr.bf16.mxu0 %v4371_v0 }
 0x3be   : > { %3370 = vmatmul.mubr.msk.bf16.vlgmr.msra.gmra.mrb[8].mxu0 %vm965_vm6, %v5012_v50 }
 0x3bf   : > { %3380 = vmatpush3.bf16.msra.mxu0 %v1119_v51  ;;  %3381 = vmatprep.mubr.msk.bf16.mxu0 %vm4372_vm0, %v4371_v0 }
 0x3c0   : > { %3391 = vmatprep.subr.bf16.mxu0 %v4371_v0 }
 0x3c6   : > { %3382 = vmatmul.mubr.msk.bf16.vlgmr.msra.gmra.mrb[12].mxu0 %vm792_vm3, %v4969_v9 }
 0x3c7   : > { %3393 = vmatprep.mubr.msk.bf16.mxu0 %vm4372_vm0, %v4371_v0 }
 0x491   : > { %v1055_v54 = vpop.f32.mrb[8].mxu0 }
 0x492   : > { %v1056_v56 = vadd.f32 %v1055_v54, %v5026_v53  ;;  %v3371_v57 = vpop.f32.mrb[9].mxu0 }
 0x493   : > { %v1058_v58 = vpop.f32.mrb[10].mxu0 }
 0x494   : > { %v1061_v59 = vmax.f32 %v1056_v56, 0.0  ;;  %v3372_v60 = vpop.f32.mrb[11].mxu0 }
 0x496   : > { %v1062_v62 = vpack.c.bf16 %v1061_v59, %v1061_v59 }
 0x498   : > { %v1067_v63 = vsel %vm917_vm4, %v1062_v62, 0 }
 0x499   : > { %3374 = vmatpush3.bf16.msra.mxu1 %v1067_v63  ;;  %v1155_v1 = vpop.f32.mrb[12].mxu0 }
 0x49a   : > { %v1253_v4 = vsub.f32 %v4994_v23, %v1155_v1  ;;  %3385 = vmatprep.subr.bf16.mxu1 %v4371_v0  ;;  %v3383_v5 = vpop.f32.mrb[13].mxu0 }
 0x49b   : > { %v1158_v7 = vpop.f32.mrb[14].mxu0 }
 0x49c   : > { %3376 = vmatmul.mubr.msk.bf16.vlgmr.msra.gmra.mrb[8].mxu1 %vm965_vm6, %v5031_v2  ;;  %v3384_v8 = vpop.f32.mrb[15].mxu0 }
 0x49d   : > { %3386 = vmatpush3.bf16.msra.mxu1 %v1166_v3  ;;  %3387 = vmatprep.mubr.msk.bf16.mxu1 %vm4372_vm0, %v4371_v0 }
 0x49e   : > { %3397 = vmatprep.subr.bf16.mxu1 %v4371_v0 }
 0x4a4   : > { %3388 = vmatmul.mubr.msk.bf16.vlgmr.msra.gmra.mrb[12].mxu1 %vm912_vm5, %v4988_v19 }
 0x4a5   : > { %3399 = vmatprep.mubr.msk.bf16.mxu1 %vm4372_vm0, %v4371_v0 }
 0x56f   : > { %v5045_v10 = vpop.f32.mrb[8].mxu1 }
 0x570   : > { %v3377_v11 = vpop.f32.mrb[9].mxu1 }
 0x571   : > { %v1106_v12 = vpop.f32.mrb[10].mxu1 }
 0x572   : > { %v3378_v13 = vpop.f32.mrb[11].mxu1 }
 0x577   : > { %v1202_v14 = vpop.f32.mrb[12].mxu1 }
 0x578   : > { %v1203_v16 = vadd.f32 %v1202_v14, %v4997_v30  ;;  %v3389_v17 = vpop.f32.mrb[13].mxu1 }
 0x579   : > { %v1205_v18 = vpop.f32.mrb[14].mxu1 }
 0x57a   : > { %v1208_v20 = vmax.f32 %v1203_v16, 0.0  ;;  %v3390_v21 = vpop.f32.mrb[15].mxu1 }
 0x57c   : > { %v1209_v22 = vpack.c.bf16 %v1208_v20, %v1208_v20 }
 0x57e   : > { %v1211_v24 = vsel %vm917_vm4, %v1209_v22, 0  ;;  %v3217_v22 = vld [vmem:[%s4918_s4 + $0xc] sm:$0xf] }
 0x57f   : > { %3392 = vmatpush3.bf16.msra.mxu0 %v1211_v24 }
 0x580   : > { %3403 = vmatprep.subr.bf16.mxu0 %v4371_v0 }
 0x582   : > { %3394 = vmatmul.mubr.msk.bf16.vlgmr.msra.gmra.mrb[16].mxu0 %vm965_vm6, %v5001_v39 }
 0x583   : > { %3405 = vmatprep.mubr.msk.bf16.mxu0 %vm4372_vm0, %v4371_v0 }
 0x655   : > { %v1247_v25 = vpop.f32.mrb[16].mxu0 }
 0x656   : > { %v1254_v26 = vadd.f32 %v1253_v4, %v1247_v25  ;;  %v1345_v27 = vrot.slane %v1247_v25, 4  ;;  %v3395_v28 = vpop.f32.mrb[17].mxu0  ;;  %v1585_v25 = vsel %vm796_vm1, %v3217_v22, 0 }
 0x657   : > { %v1250_v29 = vpop.f32.mrb[18].mxu0 }
 0x658   : > { %v1255_v31 = vpack.c.bf16 %v1254_v26, %v1254_v26  ;;  %v5054_v32 = vadd.f32 %v1345_v27, %v1155_v1  ;;  %v3396_v33 = vpop.f32.mrb[19].mxu0  ;;  %v3219_v26 = vld [vmem:[%s4927_s24 + $0xc] sm:$0x7] }
 0x659   : > { %v1629_v28 = vsub.f32 %v4967_v6, %v3219_v26 }
 0x65a   : > { %v1257_v35 = vsel %vm917_vm4, %v1255_v31, 0 }
 0x65b   : > { %3398 = vmatpush3.bf16.msra.mxu1 %v1257_v35 }
 0x65c   : > { %3409 = vmatprep.subr.bf16.mxu1 %v4371_v0 }
 0x65e   : > { %3400 = vmatmul.mubr.msk.bf16.vlgmr.msra.gmra.mrb[16].mxu1 %vm965_vm6, %v5012_v50 }
 0x65f   : > { %3410 = vmatpush3.bf16.msra.mxu1 %v1352_v36  ;;  %3411 = vmatprep.mubr.msk.bf16.mxu1 %vm4372_vm0, %v4371_v0  ;;  %v1630_v36 = vpack.c.bf16 %v1629_v28, %v1629_v28 }
 0x660   : > { %3421 = vmatprep.subr.bf16.mxu1 %v4371_v0 }
 0x666   : > { %3412 = vmatmul.mubr.msk.bf16.vlgmr.msra.gmra.mrb[20].mxu1 %vm792_vm3, %v4969_v9 }
 0x667   : > { %3423 = vmatprep.mubr.msk.bf16.mxu1 %vm4372_vm0, %v4371_v0 }
 0x731   : > { %v1293_v38 = vpop.f32.mrb[16].mxu1 }
 0x732   : > { %v1294_v41 = vadd.f32 %v1293_v38, %v5026_v53  ;;  %v3401_v42 = vpop.f32.mrb[17].mxu1 }
 0x733   : > { %v1296_v43 = vpop.f32.mrb[18].mxu1 }
 0x734   : > { %v1299_v44 = vmax.f32 %v1294_v41, 0.0  ;;  %v3402_v45 = vpop.f32.mrb[19].mxu1  ;;  %v1632_v41 = vand.u32 %v1630_v36, %v4976_v15 }
 0x736   : > { %v1300_v48 = vpack.c.bf16 %v1299_v44, %v1299_v44 }
 0x738   : > { %v1302_v49 = vsel %vm917_vm4, %v1300_v48, 0 }
 0x739   : > { %3404 = vmatpush3.bf16.msra.mxu0 %v1302_v49  ;;  %v1388_v51 = vpop.f32.mrb[20].mxu1 }
 0x73a   : > { %v1486_v54 = vsub.f32 %v4994_v23, %v1388_v51  ;;  %3415 = vmatprep.subr.bf16.mxu0 %v4371_v0  ;;  %v3413_v55 = vpop.f32.mrb[21].mxu1 }
 0x73b   : > { %v1391_v56 = vpop.f32.mrb[22].mxu1 }
 0x73c   : > { %3406 = vmatmul.mubr.msk.bf16.vlgmr.msra.gmra.mrb[20].mxu0 %vm965_vm6, %v5031_v2  ;;  %v3414_v57 = vpop.f32.mrb[23].mxu1 }
 0x73d   : > { %3416 = vmatpush3.bf16.msra.mxu0 %v1399_v52  ;;  %3417 = vmatprep.mubr.msk.bf16.mxu0 %vm4372_vm0, %v4371_v0 }
 0x73e   : > { %3427 = vmatprep.subr.bf16.mxu0 %v4371_v0 }
 0x744   : > { %3418 = vmatmul.mubr.msk.bf16.vlgmr.msra.gmra.mrb[24].mxu0 %vm912_vm5, %v4988_v19 }
 0x745   : > { %3429 = vmatprep.mubr.msk.bf16.mxu0 %vm4372_vm0, %v4371_v0 }
 0x80f   : > { %v5085_v58 = vpop.f32.mrb[20].mxu0 }
 0x810   : > { %v2747_v59 = vmax.f32 %v5045_v10, %v5085_v58  ;;  %v3407_v60 = vpop.f32.mrb[21].mxu0 }
 0x811   : > { %v1341_v61 = vpop.f32.mrb[22].mxu0 }
 0x812   : > { %v3408_v62 = vpop.f32.mrb[23].mxu0 }
 0x817   : > { %v1435_v63 = vpop.f32.mrb[24].mxu0 }
 0x818   : > { %v1436_v1 = vadd.f32 %v1435_v63, %v4997_v30  ;;  %v3419_v3 = vpop.f32.mrb[25].mxu0 }
 0x819   : > { %v1438_v4 = vpop.f32.mrb[26].mxu0 }
 0x81a   : > { %v1441_v5 = vmax.f32 %v1436_v1, 0.0  ;;  %v3420_v7 = vpop.f32.mrb[27].mxu0 }
 0x81c   : > { %v1442_v8 = vpack.c.bf16 %v1441_v5, %v1441_v5 }
 0x81e   : > { %v1444_v11 = vsel %vm917_vm4, %v1442_v8, 0 }
 0x81f   : > { %3422 = vmatpush3.bf16.msra.mxu1 %v1444_v11 }
 0x820   : > { %3433 = vmatprep.subr.bf16.mxu1 %v4371_v0 }
 0x822   : > { %3424 = vmatmul.mubr.msk.bf16.vlgmr.msra.gmra.mrb[24].mxu1 %vm965_vm6, %v5001_v39 }
 0x823   : > { %3435 = vmatprep.mubr.msk.bf16.mxu1 %vm4372_vm0, %v4371_v0 }
 0x8f5   : > { %v1480_v12 = vpop.f32.mrb[24].mxu1 }
 0x8f6   : > { %v1487_v13 = vadd.f32 %v1486_v54, %v1480_v12  ;;  %v1578_v14 = vrot.slane %v1480_v12, 4  ;;  %v3425_v16 = vpop.f32.mrb[25].mxu1  ;;  %v3224_v12 = vld [vmem:[%s4918_s4 + $0x10] sm:$0xf] }
 0x8f7   : > { %v1483_v17 = vpop.f32.mrb[26].mxu1  ;;  %v3226_v16 = vld [vmem:[%s4927_s24 + $0x10] sm:$0x7] }
 0x8f8   : > { %v1488_v18 = vpack.c.bf16 %v1487_v13, %v1487_v13  ;;  %v5096_v20 = vadd.f32 %v1578_v14, %v1388_v51  ;;  %v3426_v21 = vpop.f32.mrb[27].mxu1  ;;  %v1818_v14 = vsel %vm796_vm1, %v3224_v12, 0 }
 0x8fa   : > { %v1490_v24 = vsel %vm917_vm4, %v1488_v18, 0  ;;  %v1862_v18 = vsub.f32 %v4967_v6, %v3226_v16 }
 0x8fb   : > { %3428 = vmatpush3.bf16.msra.mxu0 %v1490_v24 }
 0x8fc   : > { %3439 = vmatprep.subr.bf16.mxu0 %v4371_v0 }
 0x8fe   : > { %3430 = vmatmul.mubr.msk.bf16.vlgmr.msra.gmra.mrb[28].mxu0 %vm965_vm6, %v5012_v50 }
 0x8ff   : > { %3440 = vmatpush3.bf16.msra.mxu0 %v1585_v25  ;;  %3441 = vmatprep.mubr.msk.bf16.mxu0 %vm4372_vm0, %v4371_v0 }
 0x900   : > { %3451 = vmatprep.subr.bf16.mxu0 %v4371_v0 }
 0x906   : > { %3442 = vmatmul.mubr.msk.bf16.vlgmr.msra.gmra.mrb[32].mxu0 %vm792_vm3, %v4969_v9 }
 0x907   : > { %3453 = vmatprep.mubr.msk.bf16.mxu0 %vm4372_vm0, %v4371_v0 }
 0x9d1   : > { %v1526_v27 = vpop.f32.mrb[28].mxu0 }
 0x9d2   : > { %v1527_v29 = vadd.f32 %v1526_v27, %v5026_v53  ;;  %v3431_v31 = vpop.f32.mrb[29].mxu0  ;;  %v1863_v27 = vpack.c.bf16 %v1862_v18, %v1862_v18 }
 0x9d3   : > { %v1529_v33 = vpop.f32.mrb[30].mxu0 }
 0x9d4   : > { %v1532_v34 = vmax.f32 %v1527_v29, 0.0  ;;  %v3432_v35 = vpop.f32.mrb[31].mxu0  ;;  %v1865_v33 = vand.u32 %v1863_v27, %v4976_v15 }
 0x9d6   : > { %v1533_v37 = vpack.c.bf16 %v1532_v34, %v1532_v34 }
 0x9d8   : > { %v1535_v38 = vsel %vm917_vm4, %v1533_v37, 0 }
 0x9d9   : > { %3434 = vmatpush3.bf16.msra.mxu1 %v1535_v38  ;;  %v1621_v40 = vpop.f32.mrb[32].mxu0 }
 0x9da   : > { %v1719_v42 = vsub.f32 %v4994_v23, %v1621_v40  ;;  %3445 = vmatprep.subr.bf16.mxu1 %v4371_v0  ;;  %v3443_v43 = vpop.f32.mrb[33].mxu0 }
 0x9db   : > { %v1624_v44 = vpop.f32.mrb[34].mxu0 }
 0x9dc   : > { %3436 = vmatmul.mubr.msk.bf16.vlgmr.msra.gmra.mrb[28].mxu1 %vm965_vm6, %v5031_v2  ;;  %v3444_v45 = vpop.f32.mrb[35].mxu0 }
 0x9dd   : > { %3446 = vmatpush3.bf16.msra.mxu1 %v1632_v41  ;;  %3447 = vmatprep.mubr.msk.bf16.mxu1 %vm4372_vm0, %v4371_v0 }
 0x9de   : > { %3457 = vmatprep.subr.bf16.mxu1 %v4371_v0 }
 0x9e4   : > { %3448 = vmatmul.mubr.msk.bf16.vlgmr.msra.gmra.mrb[32].mxu1 %vm912_vm5, %v4988_v19 }
 0x9e5   : > { %3459 = vmatprep.mubr.msk.bf16.mxu1 %vm4372_vm0, %v4371_v0 }
 0xaaf   : > { %v5127_v47 = vpop.f32.mrb[28].mxu1 }
 0xab0   : > { %v5130_v48 = vmax.f32 %v2747_v59, %v5127_v47  ;;  %v3437_v49 = vpop.f32.mrb[29].mxu1 }
 0xab1   : > { %v1574_v51 = vpop.f32.mrb[30].mxu1 }
 0xab2   : > { %v3438_v52 = vpop.f32.mrb[31].mxu1 }
 0xab7   : > { %v1668_v54 = vpop.f32.mrb[32].mxu1 }
 0xab8   : > { %v1669_v55 = vadd.f32 %v1668_v54, %v4997_v30  ;;  %v3449_v56 = vpop.f32.mrb[33].mxu1 }
 0xab9   : > { %v1671_v57 = vpop.f32.mrb[34].mxu1 }
 0xaba   : > { %v1674_v60 = vmax.f32 %v1669_v55, 0.0  ;;  %v3450_v61 = vpop.f32.mrb[35].mxu1 }
 0xabc   : > { %v1675_v62 = vpack.c.bf16 %v1674_v60, %v1674_v60 }
 0xabe   : > { %v1677_v63 = vsel %vm917_vm4, %v1675_v62, 0 }
 0xabf   : > { %3452 = vmatpush3.bf16.msra.mxu0 %v1677_v63 }
 0xac0   : > { %3463 = vmatprep.subr.bf16.mxu0 %v4371_v0 }
 0xac2   : > { %3454 = vmatmul.mubr.msk.bf16.vlgmr.msra.gmra.mrb[36].mxu0 %vm965_vm6, %v5001_v39 }
 0xac3   : > { %3465 = vmatprep.mubr.msk.bf16.mxu0 %vm4372_vm0, %v4371_v0 }
 0xb95   : > { %v1713_v59 = vpop.f32.mrb[36].mxu0 }
 0xb96   : > { %v1720_v1 = vadd.f32 %v1719_v42, %v1713_v59  ;;  %v1811_v3 = vrot.slane %v1713_v59, 4  ;;  %v3455_v4 = vpop.f32.mrb[37].mxu0 }
 0xb97   : > { %v1716_v5 = vpop.f32.mrb[38].mxu0 }
 0xb98   : > { %v1721_v7 = vpack.c.bf16 %v1720_v1, %v1720_v1  ;;  %v5139_v8 = vadd.f32 %v1811_v3, %v1621_v40  ;;  %v3456_v11 = vpop.f32.mrb[39].mxu0  ;;  %v3231_v3 = vld [vmem:[%s4918_s4 + $0x14] sm:$0xf] }
 0xb99   : > { %v2051_v5 = vsel %vm796_vm1, %v3231_v3, 0  ;;  %v3240_v3 = vld [vmem:[%s4927_s24 + $0x18] sm:$0x7] }
 0xb9a   : > { %v1723_v13 = vsel %vm917_vm4, %v1721_v7, 0  ;;  %v3233_v7 = vld [vmem:[%s4927_s24 + $0x14] sm:$0x7] }
 0xb9b   : > { %3458 = vmatpush3.bf16.msra.mxu1 %v1723_v13  ;;  %v2095_v12 = vsub.f32 %v4967_v6, %v3233_v7 }
 0xb9c   : > { %3469 = vmatprep.subr.bf16.mxu1 %v4371_v0 }
 0xb9e   : > { %3460 = vmatmul.mubr.msk.bf16.vlgmr.msra.gmra.mrb[36].mxu1 %vm965_vm6, %v5012_v50 }
 0xb9f   : > { %3470 = vmatpush3.bf16.msra.mxu1 %v1818_v14  ;;  %3471 = vmatprep.mubr.msk.bf16.mxu1 %vm4372_vm0, %v4371_v0 }
 0xba0   : > { %3481 = vmatprep.subr.bf16.mxu1 %v4371_v0 }
 0xba6   : > { %3472 = vmatmul.mubr.msk.bf16.vlgmr.msra.gmra.mrb[40].mxu1 %vm792_vm3, %v4969_v9 }
 0xba7   : > { %3483 = vmatprep.mubr.msk.bf16.mxu1 %vm4372_vm0, %v4371_v0 }
 0xc71   : > { %v1759_v17 = vpop.f32.mrb[36].mxu1 }
 0xc72   : > { %v1760_v21 = vadd.f32 %v1759_v17, %v5026_v53  ;;  %v3461_v22 = vpop.f32.mrb[37].mxu1 }
 0xc73   : > { %v1762_v24 = vpop.f32.mrb[38].mxu1 }
 0xc74   : > { %v1765_v25 = vmax.f32 %v1760_v21, 0.0  ;;  %v3462_v26 = vpop.f32.mrb[39].mxu1  ;;  %v2096_v21 = vpack.c.bf16 %v2095_v12, %v2095_v12 }
 0xc76   : > { %v1766_v28 = vpack.c.bf16 %v1765_v25, %v1765_v25  ;;  %v2098_v26 = vand.u32 %v2096_v21, %v4976_v15 }
 0xc78   : > { %v1768_v29 = vsel %vm917_vm4, %v1766_v28, 0 }
 0xc79   : > { %3464 = vmatpush3.bf16.msra.mxu0 %v1768_v29  ;;  %v1854_v31 = vpop.f32.mrb[40].mxu1 }
 0xc7a   : > { %v1952_v34 = vsub.f32 %v4994_v23, %v1854_v31  ;;  %3475 = vmatprep.subr.bf16.mxu0 %v4371_v0  ;;  %v3473_v35 = vpop.f32.mrb[41].mxu1 }
 0xc7b   : > { %v1857_v36 = vpop.f32.mrb[42].mxu1 }
 0xc7c   : > { %3466 = vmatmul.mubr.msk.bf16.vlgmr.msra.gmra.mrb[40].mxu0 %vm965_vm6, %v5031_v2  ;;  %v3474_v37 = vpop.f32.mrb[43].mxu1 }
 0xc7d   : > { %3476 = vmatpush3.bf16.msra.mxu0 %v1865_v33  ;;  %3477 = vmatprep.mubr.msk.bf16.mxu0 %vm4372_vm0, %v4371_v0 }
 0xc7e   : > { %3487 = vmatprep.subr.bf16.mxu0 %v4371_v0 }
 0xc84   : > { %3478 = vmatmul.mubr.msk.bf16.vlgmr.msra.gmra.mrb[44].mxu0 %vm912_vm5, %v4988_v19 }
 0xc85   : > { %3489 = vmatprep.mubr.msk.bf16.mxu0 %vm4372_vm0, %v4371_v0 }
 0xd4f   : > { %v5170_v38 = vpop.f32.mrb[40].mxu0 }
 0xd50   : > { %v2749_v40 = vmax.f32 %v5130_v48, %v5170_v38  ;;  %v3467_v41 = vpop.f32.mrb[41].mxu0 }
 0xd51   : > { %v1807_v42 = vpop.f32.mrb[42].mxu0 }
 0xd52   : > { %v3468_v43 = vpop.f32.mrb[43].mxu0 }
 0xd57   : > { %v1901_v44 = vpop.f32.mrb[44].mxu0 }
 0xd58   : > { %v1902_v45 = vadd.f32 %v1901_v44, %v4997_v30  ;;  %v3479_v49 = vpop.f32.mrb[45].mxu0 }
 0xd59   : > { %v1904_v51 = vpop.f32.mrb[46].mxu0 }
 0xd5a   : > { %v1907_v52 = vmax.f32 %v1902_v45, 0.0  ;;  %v3480_v54 = vpop.f32.mrb[47].mxu0 }
 0xd5c   : > { %v1908_v55 = vpack.c.bf16 %v1907_v52, %v1907_v52 }
 0xd5e   : > { %v1910_v56 = vsel %vm917_vm4, %v1908_v55, 0 }
 0xd5f   : > { %3482 = vmatpush3.bf16.msra.mxu1 %v1910_v56 }
 0xd60   : > { %3493 = vmatprep.subr.bf16.mxu1 %v4371_v0 }
 0xd62   : > { %3484 = vmatmul.mubr.msk.bf16.vlgmr.msra.gmra.mrb[44].mxu1 %vm965_vm6, %v5001_v39 }
 0xd63   : > { %3495 = vmatprep.mubr.msk.bf16.mxu1 %vm4372_vm0, %v4371_v0 }
 0xe35   : > { %v1946_v48 = vpop.f32.mrb[44].mxu1 }
 0xe36   : > { %v1953_v57 = vadd.f32 %v1952_v34, %v1946_v48  ;;  %v2044_v60 = vrot.slane %v1946_v48, 4  ;;  %v3485_v61 = vpop.f32.mrb[45].mxu1 }
 0xe37   : > { %v1949_v62 = vpop.f32.mrb[46].mxu1 }
 0xe38   : > { %v1954_v63 = vpack.c.bf16 %v1953_v57, %v1953_v57  ;;  %v5181_v59 = vadd.f32 %v2044_v60, %v1854_v31  ;;  %v3486_v1 = vpop.f32.mrb[47].mxu1  ;;  %v3238_v62 = vld [vmem:[%s4918_s4 + $0x18] sm:$0xf] }
 0xe39   : > { %v2284_v1 = vsel %vm796_vm1, %v3238_v62, 0 }
 0xe3a   : > { %v1956_v4 = vsel %vm917_vm4, %v1954_v63, 0 }
 0xe3b   : > { %3488 = vmatpush3.bf16.msra.mxu0 %v1956_v4 }
 0xe3c   : > { %3499 = vmatprep.subr.bf16.mxu0 %v4371_v0 }
 0xe3e   : > { %3490 = vmatmul.mubr.msk.bf16.vlgmr.msra.gmra.mrb[48].mxu0 %vm965_vm6, %v5012_v50 }
 0xe3f   : > { %3500 = vmatpush3.bf16.msra.mxu0 %v2051_v5  ;;  %3501 = vmatprep.mubr.msk.bf16.mxu0 %vm4372_vm0, %v4371_v0  ;;  %v2328_v5 = vsub.f32 %v4967_v6, %v3240_v3 }
 0xe40   : > { %3511 = vmatprep.subr.bf16.mxu0 %v4371_v0 }
 0xe46   : > { %3502 = vmatmul.mubr.msk.bf16.vlgmr.msra.gmra.mrb[52].mxu0 %vm792_vm3, %v4969_v9 }
 0xe47   : > { %3513 = vmatprep.mubr.msk.bf16.mxu0 %vm4372_vm0, %v4371_v0 }
 0xf11   : > { %v1992_v11 = vpop.f32.mrb[48].mxu0 }
 0xf12   : > { %v1993_v13 = vadd.f32 %v1992_v11, %v5026_v53  ;;  %v3491_v14 = vpop.f32.mrb[49].mxu0 }
 0xf13   : > { %v1995_v16 = vpop.f32.mrb[50].mxu0 }
 0xf14   : > { %v1998_v17 = vmax.f32 %v1993_v13, 0.0  ;;  %v3492_v18 = vpop.f32.mrb[51].mxu0  ;;  %v2329_v16 = vpack.c.bf16 %v2328_v5, %v2328_v5 }
 0xf16   : > { %v1999_v22 = vpack.c.bf16 %v1998_v17, %v1998_v17 }
 0xf18   : > { %v2001_v24 = vsel %vm917_vm4, %v1999_v22, 0  ;;  %v2331_v22 = vand.u32 %v2329_v16, %v4976_v15 }
 0xf19   : > { %3494 = vmatpush3.bf16.msra.mxu1 %v2001_v24  ;;  %v2087_v25 = vpop.f32.mrb[52].mxu0 }
 0xf1a   : > { %v2185_v27 = vsub.f32 %v4994_v23, %v2087_v25  ;;  %3505 = vmatprep.subr.bf16.mxu1 %v4371_v0  ;;  %v3503_v28 = vpop.f32.mrb[53].mxu0 }
 0xf1b   : > { %v2090_v29 = vpop.f32.mrb[54].mxu0 }
 0xf1c   : > { %3496 = vmatmul.mubr.msk.bf16.vlgmr.msra.gmra.mrb[48].mxu1 %vm965_vm6, %v5031_v2  ;;  %v3504_v31 = vpop.f32.mrb[55].mxu0 }
 0xf1d   : > { %3506 = vmatpush3.bf16.msra.mxu1 %v2098_v26  ;;  %3507 = vmatprep.mubr.msk.bf16.mxu1 %vm4372_vm0, %v4371_v0 }
 0xf1e   : > { %3517 = vmatprep.subr.bf16.mxu1 %v4371_v0 }
 0xf24   : > { %3508 = vmatmul.mubr.msk.bf16.vlgmr.msra.gmra.mrb[52].mxu1 %vm912_vm5, %v4988_v19 }
 0xf25   : > { %3519 = vmatprep.mubr.msk.bf16.mxu1 %vm4372_vm0, %v4371_v0 }
 0xfef   : > { %v5212_v33 = vpop.f32.mrb[48].mxu1 }
 0xff0   : > { %v5215_v34 = vmax.f32 %v2749_v40, %v5212_v33  ;;  %v3497_v35 = vpop.f32.mrb[49].mxu1 }
 0xff1   : > { %v2040_v36 = vpop.f32.mrb[50].mxu1 }
 0xff2   : > { %v3498_v37 = vpop.f32.mrb[51].mxu1 }
 0xff7   : > { %v2134_v41 = vpop.f32.mrb[52].mxu1 }
 0xff8   : > { %v2135_v42 = vadd.f32 %v2134_v41, %v4997_v30  ;;  %v3509_v43 = vpop.f32.mrb[53].mxu1 }
 0xff9   : > { %v2137_v44 = vpop.f32.mrb[54].mxu1 }
 0xffa   : > { %v2140_v45 = vmax.f32 %v2135_v42, 0.0  ;;  %v3510_v49 = vpop.f32.mrb[55].mxu1 }
 0xffc   : > { %v2141_v51 = vpack.c.bf16 %v2140_v45, %v2140_v45 }
 0xffe   : > { %v2143_v52 = vsel %vm917_vm4, %v2141_v51, 0 }
 0xfff   : > { %3512 = vmatpush3.bf16.msra.mxu0 %v2143_v52 }
0x1000   : > { %3523 = vmatprep.subr.bf16.mxu0 %v4371_v0 }
0x1002   : > { %3514 = vmatmul.mubr.msk.bf16.vlgmr.msra.gmra.mrb[56].mxu0 %vm965_vm6, %v5001_v39 }
0x1003   : > { %3525 = vmatprep.mubr.msk.bf16.mxu0 %vm4372_vm0, %v4371_v0 }
0x10d5   : > { %v2179_v40 = vpop.f32.mrb[56].mxu0 }
0x10d6   : > { %v2186_v54 = vadd.f32 %v2185_v27, %v2179_v40  ;;  %v2277_v55 = vrot.slane %v2179_v40, 4  ;;  %v3515_v56 = vpop.f32.mrb[57].mxu0 }
0x10d7   : > { %v2182_v48 = vpop.f32.mrb[58].mxu0 }
0x10d8   : > { %v2187_v57 = vpack.c.bf16 %v2186_v54, %v2186_v54  ;;  %v5224_v60 = vadd.f32 %v2277_v55, %v2087_v25  ;;  %v3516_v61 = vpop.f32.mrb[59].mxu0 }
0x10d9   : > { %v3245_v61 = vld [vmem:[%s4918_s4 + $0x1c] sm:$0xf] }
0x10da   : > { %v2189_v63 = vsel %vm917_vm4, %v2187_v57, 0 }
0x10db   : > { %3518 = vmatpush3.bf16.msra.mxu1 %v2189_v63  ;;  %v2517_v63 = vsel %vm796_vm1, %v3245_v61, 0 }
0x10dc   : > { %3529 = vmatprep.subr.bf16.mxu1 %v4371_v0 }
0x10de   : > { %3520 = vmatmul.mubr.msk.bf16.vlgmr.msra.gmra.mrb[56].mxu1 %vm965_vm6, %v5012_v50 }
0x10df   : > { %3530 = vmatpush3.bf16.msra.mxu1 %v2284_v1  ;;  %3531 = vmatprep.mubr.msk.bf16.mxu1 %vm4372_vm0, %v4371_v0  ;;  %v3247_v1 = vld [vmem:[%s4927_s24 + $0x1c] sm:$0x7] }
0x10e0   : > { %3541 = vmatprep.subr.bf16.mxu1 %v4371_v0 }
0x10e6   : > { %3532 = vmatmul.mubr.msk.bf16.vlgmr.msra.gmra.mrb[60].mxu1 %vm792_vm3, %v4969_v9 }
0x10e7   : > { %3543 = vmatprep.mubr.msk.bf16.mxu1 %vm4372_vm0, %v4371_v0 }
0x11b1   : > { %v2225_v4 = vpop.f32.mrb[56].mxu1 }
0x11b2   : > { %v2226_v7 = vadd.f32 %v2225_v4, %v5026_v53  ;;  %v3521_v11 = vpop.f32.mrb[57].mxu1  ;;  %v2561_v4 = vsub.f32 %v4967_v6, %v3247_v1 }
0x11b3   : > { %v2228_v12 = vpop.f32.mrb[58].mxu1 }
0x11b4   : > { %v2231_v13 = vmax.f32 %v2226_v7, 0.0  ;;  %v3522_v14 = vpop.f32.mrb[59].mxu1 }
0x11b5   : > { %v2562_v14 = vpack.c.bf16 %v2561_v4, %v2561_v4 }
0x11b6   : > { %v2232_v17 = vpack.c.bf16 %v2231_v13, %v2231_v13 }
0x11b8   : > { %v2234_v18 = vsel %vm917_vm4, %v2232_v17, 0 }
0x11b9   : > { %3524 = vmatpush3.bf16.msra.mxu0 %v2234_v18  ;;  %v2320_v21 = vpop.f32.mrb[60].mxu1 }
0x11ba   : > { %v2418_v24 = vsub.f32 %v4994_v23, %v2320_v21  ;;  %3535 = vmatprep.subr.bf16.mxu0 %v4371_v0  ;;  %v3533_v25 = vpop.f32.mrb[61].mxu1 }
0x11bb   : > { %v2323_v26 = vpop.f32.mrb[62].mxu1 }
0x11bc   : > { %3526 = vmatmul.mubr.msk.bf16.vlgmr.msra.gmra.mrb[60].mxu0 %vm965_vm6, %v5031_v2  ;;  %v3534_v27 = vpop.f32.mrb[63].mxu1 }
0x11bd   : > { %3536 = vmatpush3.bf16.msra.mxu0 %v2331_v22  ;;  %3537 = vmatprep.mubr.msk.bf16.mxu0 %vm4372_vm0, %v4371_v0 }
0x11be   : > { %3547 = vmatprep.subr.bf16.mxu0 %v4371_v0 }
0x11c4   : > { %3538 = vmatmul.mubr.msk.bf16.vlgmr.msra.gmra.mrb[64].mxu0 %vm912_vm5, %v4988_v19 }
0x11c5   : > { %3549 = vmatprep.mubr.msk.bf16.mxu0 %vm4372_vm0, %v4371_v0 }
0x128f   : > { %v5255_v28 = vpop.f32.mrb[60].mxu0 }
0x1290   : > { %v2751_v29 = vmax.f32 %v5215_v34, %v5255_v28  ;;  %v3527_v31 = vpop.f32.mrb[61].mxu0 }
0x1291   : > { %v2273_v35 = vpop.f32.mrb[62].mxu0 }
0x1292   : > { %v3528_v36 = vpop.f32.mrb[63].mxu0 }
0x1297   : > { %v2367_v37 = vpop.f32.mrb[64].mxu0 }
0x1298   : > { %v2368_v41 = vadd.f32 %v2367_v37, %v4997_v30  ;;  %v3539_v42 = vpop.f32.mrb[65].mxu0 }
0x1299   : > { %v2370_v43 = vpop.f32.mrb[66].mxu0 }
0x129a   : > { %v2373_v44 = vmax.f32 %v2368_v41, 0.0  ;;  %v3540_v45 = vpop.f32.mrb[67].mxu0 }
0x129c   : > { %v2374_v49 = vpack.c.bf16 %v2373_v44, %v2373_v44 }
0x129e   : > { %v2376_v51 = vsel %vm917_vm4, %v2374_v49, 0 }
0x129f   : > { %3542 = vmatpush3.bf16.msra.mxu1 %v2376_v51 }
0x12a0   : > { %3553 = vmatprep.subr.bf16.mxu1 %v4371_v0 }
0x12a2   : > { %3544 = vmatmul.mubr.msk.bf16.vlgmr.msra.gmra.mrb[64].mxu1 %vm965_vm6, %v5001_v39 }
0x12a3   : > { %3555 = vmatprep.mubr.msk.bf16.mxu1 %vm4372_vm0, %v4371_v0 }
0x1375   : > { %v2412_v34 = vpop.f32.mrb[64].mxu1 }
0x1376   : > { %v2419_v52 = vadd.f32 %v2418_v24, %v2412_v34  ;;  %v2510_v40 = vrot.slane %v2412_v34, 4  ;;  %v3545_v54 = vpop.f32.mrb[65].mxu1 }
0x1377   : > { %v2415_v55 = vpop.f32.mrb[66].mxu1 }
0x1378   : > { %v2420_v56 = vpack.c.bf16 %v2419_v52, %v2419_v52  ;;  %v5266_v48 = vadd.f32 %v2510_v40, %v2320_v21  ;;  %v3546_v57 = vpop.f32.mrb[67].mxu1 }
0x137a   : > { %v2422_v62 = vsel %vm917_vm4, %v2420_v56, 0 }
0x137b   : > { %3548 = vmatpush3.bf16.msra.mxu0 %v2422_v62 }
0x137c   : > { %3559 = vmatprep.subr.bf16.mxu0 %v4371_v0 }
0x137e   : > { %3550 = vmatmul.mubr.msk.bf16.vlgmr.msra.gmra.mrb[68].mxu0 %vm965_vm6, %v5012_v50 }
0x137f   : > { %3560 = vmatpush3.bf16.msra.mxu0 %v2517_v63  ;;  %3561 = vmatprep.mubr.msk.bf16.mxu0 %vm4372_vm0, %v4371_v0 }
0x1380   : > { %3571 = vmatprep.subr.bf16.mxu0 %v4371_v0 }
0x1386   : > { %3562 = vmatmul.mubr.msk.bf16.vlgmr.msra.gmra.mrb[72].mxu0 %vm792_vm3, %v4969_v9  ;;  %v2564_v9 = vand.u32 %v2562_v14, %v4976_v15 }
0x1387   : > { %3573 = vmatprep.mubr.msk.bf16.mxu0 %vm4372_vm0, %v4371_v0 }
0x1451   : > { %v2458_v3 = vpop.f32.mrb[68].mxu0 }
0x1452   : > { %v2459_v5 = vadd.f32 %v2458_v3, %v5026_v53  ;;  %v3551_v7 = vpop.f32.mrb[69].mxu0 }
0x1453   : > { %v2461_v11 = vpop.f32.mrb[70].mxu0 }
0x1454   : > { %v2464_v12 = vmax.f32 %v2459_v5, 0.0  ;;  %v3552_v13 = vpop.f32.mrb[71].mxu0 }
0x1456   : > { %v2465_v16 = vpack.c.bf16 %v2464_v12, %v2464_v12 }
0x1458   : > { %v2467_v17 = vsel %vm917_vm4, %v2465_v16, 0 }
0x1459   : > { %3554 = vmatpush3.bf16.msra.mxu1 %v2467_v17  ;;  %v2553_v18 = vpop.f32.mrb[72].mxu0  ;;  %v861_v17 = vpop.permute.xlu1 %860 }
0x145a   : > { %v2651_v21 = vsub.f32 %v4994_v23, %v2553_v18  ;;  %3565 = vmatprep.subr.bf16.mxu1 %v4371_v0  ;;  %v3563_v22 = vpop.f32.mrb[73].mxu0 }
0x145b   : > { %v2556_v6 = vpop.f32.mrb[74].mxu0 }
0x145c   : > { %3556 = vmatmul.mubr.msk.bf16.vlgmr.msra.gmra.mrb[68].mxu1 %vm965_vm6, %v5031_v2  ;;  %v3564_v24 = vpop.f32.mrb[75].mxu0 }
0x145d   : > { %3566 = vmatpush3.bf16.msra.mxu1 %v2564_v9  ;;  %3567 = vmatprep.mubr.msk.bf16.mxu1 %vm4372_vm0, %v4371_v0 }
0x145e   : > { %3577 = vmatprep.subr.bf16.mxu1 %v4371_v0 }
0x1464   : > { %3568 = vmatmul.mubr.msk.bf16.vlgmr.msra.gmra.mrb[72].mxu1 %vm912_vm5, %v4988_v19 }
0x1465   : > { %3579 = vmatprep.mubr.msk.bf16.mxu1 %vm4372_vm0, %v4371_v0 }
0x152f   : > { %v5297_v15 = vpop.f32.mrb[68].mxu1 }
0x1530   : > { %v2752_v23 = vmax.f32 %v2751_v29, %v5297_v15  ;;  %v3557_v25 = vpop.f32.mrb[69].mxu1 }
0x1531   : > { %v2506_v26 = vpop.f32.mrb[70].mxu1 }
0x1532   : > { %v3558_v27 = vpop.f32.mrb[71].mxu1 }
0x1537   : > { %v2600_v31 = vpop.f32.mrb[72].mxu1 }
0x1538   : > { %v2601_v35 = vadd.f32 %v2600_v31, %v4997_v30  ;;  %v3569_v36 = vpop.f32.mrb[73].mxu1 }
0x1539   : > { %v2603_v37 = vpop.f32.mrb[74].mxu1 }
0x153a   : > { %v2606_v41 = vmax.f32 %v2601_v35, 0.0  ;;  %v3570_v42 = vpop.f32.mrb[75].mxu1 }
0x153c   : > { %v2607_v43 = vpack.c.bf16 %v2606_v41, %v2606_v41 }
0x153e   : > { %v2609_v19 = vsel %vm917_vm4, %v2607_v43, 0 }
0x153f   : > { %3572 = vmatpush3.bf16.msra.mxu0 %v2609_v19 }
0x1540   : > { %3583 = vmatprep.subr.bf16.mxu0 %v4371_v0 }
0x1542   : > { %3574 = vmatmul.mubr.msk.bf16.vlgmr.msra.gmra.mrb[76].mxu0 %vm965_vm6, %v5001_v39  ;;  %v2830_v39 = vld [vmem:[#allocation23] sm:$0xff] }
0x1543   : > { %3585 = vmatprep.mubr.msk.bf16.mxu0 %vm4372_vm0, %v4371_v0  ;;  %2833 = vperm.xlu1 %3790, %v2830_v39  }
0x1615   : > { %v2645_v29 = vpop.f32.mrb[76].mxu0 }
0x1616   : > { %v2652_v44 = vadd.f32 %v2651_v21, %v2645_v29  ;;  %v2743_v45 = vrot.slane %v2645_v29, 4  ;;  %v3575_v30 = vpop.f32.mrb[77].mxu0 }
0x1617   : > { %v2648_v49 = vpop.f32.mrb[78].mxu0 }
0x1618   : > { %v2653_v51 = vpack.c.bf16 %v2652_v44, %v2652_v44  ;;  %v5307_v34 = vadd.f32 %v2743_v45, %v2553_v18  ;;  %v3576_v52 = vpop.f32.mrb[79].mxu0 }
0x161a   : > { %v2655_v40 = vsel %vm917_vm4, %v2653_v51, 0 }
0x161b   : > { %3578 = vmatpush3.bf16.msra.mxu1 %v2655_v40 }
0x161c   : > { %3589 = vmatprep.subr.bf16.mxu1 %v4371_v0 }
0x161e   : > { %3580 = vmatmul.mubr.msk.bf16.vlgmr.msra.gmra.mrb[76].mxu1 %vm965_vm6, %v5012_v50 }
0x161f   : > { %3591 = vmatprep.mubr.msk.bf16.mxu1 %vm4372_vm0, %v4371_v0 }
0x16f1   : > { %v2691_v54 = vpop.f32.mrb[76].mxu1 }
0x16f2   : > { %v2692_v55 = vadd.f32 %v2691_v54, %v5026_v53  ;;  %v3581_v56 = vpop.f32.mrb[77].mxu1 }
0x16f3   : > { %v2694_v57 = vpop.f32.mrb[78].mxu1 }
0x16f4   : > { %v2697_v61 = vmax.f32 %v2692_v55, 0.0  ;;  %v3582_v62 = vpop.f32.mrb[79].mxu1 }
0x16f6   : > { %v2698_v63 = vpack.c.bf16 %v2697_v61, %v2697_v61 }
0x16f8   : > { %v2700_v1 = vsel %vm917_vm4, %v2698_v63, 0 }
0x16f9   : > { %3584 = vmatpush3.bf16.msra.mxu0 %v2700_v1 }
0x16fc   : > { %3586 = vmatmul.mubr.msk.bf16.vlgmr.msra.gmra.mrb[80].mxu0 %vm965_vm6, %v5031_v2 }
0x17cf   : > { %v2736_v50 = vpop.f32.mrb[80].mxu0 }
0x17d0   : > { %v2753_v3 = vmax.f32 %v2752_v23, %v2736_v50  ;;  %v3587_v4 = vpop.f32.mrb[81].mxu0 }
0x17d1   : > { %v2739_v0 = vpop.f32.mrb[82].mxu0 }
0x17d2   : > { %v2754_v5 = vsub.f32 %v5045_v10, %v2753_v3  ;;  %v2763_v7 = vsub.f32 %v5085_v58, %v2753_v3  ;;  %v2772_v53 = vsub.f32 %v5127_v47, %v2753_v3  ;;  %v2781_v11 = vsub.f32 %v5170_v38, %v2753_v3  ;;  %v3588_v12 = vpop.f32.mrb[83].mxu0 }
0x17d3   : > { %v2790_v13 = vsub.f32 %v5212_v33, %v2753_v3  ;;  %v2799_v14 = vsub.f32 %v5255_v28, %v2753_v3  ;;  %v2808_v16 = vsub.f32 %v5297_v15, %v2753_v3  ;;  %v2817_v2 = vsub.f32 %v2736_v50, %v2753_v3 }
0x17d4   : > { %v2755_v18 = vmul.f32 1.442695, %v2754_v5  ;;  %v2764_v9 = vmul.f32 1.442695, %v2763_v7  ;;  %v2773_v21 = vmul.f32 1.442695, %v2772_v53 }
0x17d5   : > { %v2782_v22 = vmul.f32 1.442695, %v2781_v11  ;;  %v2791_v10 = vmul.f32 1.442695, %v2790_v13  ;;  %v1113_v58 = vrot.slane %v861_v17, 4 }
0x17d6   : > { %3791 = vpow2.f32 %v2755_v18  ;;  %v2800_v47 = vmul.f32 1.442695, %v2799_v14  ;;  %v2809_v38 = vmul.f32 1.442695, %v2808_v16  ;;  %v2818_v6 = vmul.f32 1.442695, %v2817_v2  ;;  %v2834_v14 = vpop.permute.xlu1 %2833 }
0x17d7   : > { %3793 = vpow2.f32 %v2764_v9  ;;  %v1115_v33 = vadd.f32 %v1113_v58, %v5008_v46  ;;  %v1348_v28 = vadd.f32 %v5054_v32, %v1113_v58  ;;  %v1581_v24 = vadd.f32 %v5096_v20, %v1113_v58  ;;  %v2828_v13 = vld [vmem:[#allocation22] sm:$0xf] }
0x17d8   : > { %3795 = vpow2.f32 %v2773_v21  ;;  %v1814_v15 = vadd.f32 %v5139_v8, %v1113_v58  ;;  %v2047_v23 = vadd.f32 %v5181_v59, %v1113_v58  ;;  %v2280_v31 = vadd.f32 %v5224_v60, %v1113_v58  ;;  %v3809_v9 = vld [vmem:[%s4910_s27] sm:$0xff]  ;;  %s4375_s27 = smov [#allocation26]  }
0x17d9   : > { %3797 = vpow2.f32 %v2782_v22  ;;  %v2759_v25 = vrot.slane %v1115_v33, 4  ;;  %v2768_v27 = vrot.slane %v1348_v28, 4  ;;  %v2777_v36 = vrot.slane %v1581_v24, 4  ;;  %s4242_s12 = sshll.u32 %s4375_s27, 4  ;;  %s4243_s12 = int_to_ptr.vmem [resolvable:$false] %s4242_s12 }
0x17da   : > { %3799 = vpow2.f32 %v2791_v10  ;;  %v2513_v37 = vadd.f32 %v5266_v48, %v1113_v58  ;;  %v2786_v32 = vrot.slane %v1814_v15, 4  ;;  %v2746_v42 = vadd.f32 %v5307_v34, %v1113_v58  ;;  %s4244_s14 = scalar_lea.vmem %s4243_s12, 256  ;;  %p4245_p8 = scmp.lt.s32.totalorder %s5345_s20, %s4243_s12 }
0x17db   : > { %3801 = vpow2.f32 %v2800_v47  ;;  %v2795_v8 = vrot.slane %v2047_v23, 4  ;;  %v2804_v44 = vrot.slane %v2280_v31, 4  ;;  %p4246_p6 = scmp.lt.s32.totalorder %s4244_s14, %s4238_s16 }
0x17dc   : > { %3803 = vpow2.f32 %v2809_v38  ;;  %v2813_v51 = vrot.slane %v2513_v37, 4  ;;  %v2822_v48 = vrot.slane %v2746_v42, 4 }
0x17dd   : > { %3805 = vpow2.f32 %v2818_v6  ;;  %p4247_p0 = por %p4246_p6, %p4245_p8 }
0x17df   : > { %p4248_p13 = pnand %p4247_p0, %p4241_p12 }
0x17e0   : > { %v3792_v26 = vpop.eup %3791 }
0x17e1   : > { %v3794_v35 = vpop.eup %3793  ;;  %v2761_v46 = vmul.f32 %v3792_v26, %v2759_v25 }
0x17e2   : > { %v3796_v41 = vpop.eup %3795  ;;  %v2766_v20 = vadd.f32 %v3794_v35, %v3792_v26  ;;  %v2770_v43 = vmul.f32 %v3794_v35, %v2768_v27 }
0x17e3   : > { %v3798_v19 = vpop.eup %3797  ;;  %v2779_v29 = vmul.f32 %v3796_v41, %v2777_v36 }
0x17e4   : > { %v3800_v59 = vpop.eup %3799  ;;  %v2775_v45 = vadd.f32 %v3796_v41, %v2766_v20  ;;  %v2771_v30 = vadd.f32 %v2770_v43, %v2761_v46  ;;  %v2788_v49 = vmul.f32 %v3798_v19, %v2786_v32 }
0x17e5   : > { %v3802_v60 = vpop.eup %3801  ;;  %v2797_v52 = vmul.f32 %v3800_v59, %v2795_v8 }
0x17e6   : > { %v3804_v40 = vpop.eup %3803  ;;  %v2784_v39 = vadd.f32 %v3798_v19, %v2775_v45  ;;  %v2780_v54 = vadd.f32 %v2779_v29, %v2771_v30  ;;  %v2806_v55 = vmul.f32 %v3802_v60, %v2804_v44 }
0x17e7   : > { %v3806_v56 = vpop.eup %3805  ;;  %v2815_v34 = vmul.f32 %v3804_v40, %v2813_v51 }
0x17e8   : > { %v2793_v57 = vadd.f32 %v3800_v59, %v2784_v39  ;;  %v2789_v61 = vadd.f32 %v2788_v49, %v2780_v54  ;;  %v2824_v62 = vmul.f32 %v3806_v56, %v2822_v48 }
0x17ea   : > { %v2802_v63 = vadd.f32 %v3802_v60, %v2793_v57  ;;  %v2798_v1 = vadd.f32 %v2797_v52, %v2789_v61 }
0x17ec   : > { %v2811_v50 = vadd.f32 %v3804_v40, %v2802_v63  ;;  %v2807_v3 = vadd.f32 %v2806_v55, %v2798_v1 }
0x17ee   : > { %v2820_v4 = vadd.f32 %v3806_v56, %v2811_v50  ;;  %v2816_v0 = vadd.f32 %v2815_v34, %v2807_v3 }
0x17f0   : > { %3807 = vrcp.f32 %v2820_v4  ;;  %v2825_v5 = vadd.f32 %v2824_v62, %v2816_v0 }
0x17fa   : > { %v3808_v7 = vpop.eup %3807 }
0x17fb   : > { %v2827_v53 = vmul.f32 %v3808_v7, %v2825_v5 }
0x17fd   : > { %v2829_v11 = vpack.c.bf16 %v2827_v53, %v2827_v53 }
0x17ff   : > { %v2840_v12 = vsel %vm917_vm4, %v2829_v11, 0 }
0x1800   : > { %3590 = vmatpush3.bf16.msra.mxu1 %v2840_v12 }
0x1803   : > { %3592 = vmatmul.mubr.msk.bf16.vlgmr.msra.gmra.mrb[80].mxu1 %vm965_vm6, %v2828_v13 }
0x18d6   : > { %v2876_v16 = vpop.f32.mrb[80].mxu1 }
0x18d7   : > { %v2877_v2 = vadd.f32 %v2876_v16, %v2834_v14  ;;  %v3593_v17 = vpop.f32.mrb[81].mxu1 }
0x18d8   : > { %v2879_v18 = vpop.f32.mrb[82].mxu1 }
0x18d9   : > { %v2882_v21 = vadd.f32 %v3809_v9, %v2877_v2  ;;  %v3594_v22 = vpop.f32.mrb[83].mxu1 }
0x18db   : > { %2884 = vst.msk [vmem:[%s786_s17] sm:$0xff] %vm2883_vm7, %v2882_v21 }
0x18dc   : > { %4251 = shalt.err (!%p4248_p13)
}
0x18dd   : > { %s4252_s1 = scalar_lea.hbm %s5343_s13, 128  ;;  %s4256_s4 = scalar_lea.hbm %s5511_s29, 256 }
0x18de   : > { %p4253_p5 = scmp.ne.s32.totalorder %s5343_s13, %s4252_s1  ;;  %p4257_p9 = scmp.lt.u32.totalorder %s5343_s13, %s5511_s29 }
0x18df   : > { %p4258_p1 = scmp.lt.u32.totalorder %s4256_s4, %s4252_s1  ;;  %p4260_p4 = scmp.lt.u32.totalorder %s4252_s1, %s5343_s13 }
0x18e0   : > { %p4254_p2 = pnand %p4253_p5, %p5512_p3 }
0x18e1   : > { %p4259_p11 = por %p4258_p1, %p4257_p9 }
0x18e2   : > { %p4255_p10 = pneg %p4254_p2 }
0x18e3   : > { %p4261_p7 = por %p4260_p4, %p4259_p11 }
0x18e5   : > { %p4262_p12 = pnand %p4261_p7, %p4255_p10 }
0x18e7   : > { %4265 = shalt.err (!%p4262_p12)
}
0x18e8   : > { %3647 = dma.vmem_to_hbm [thread:$0]  (%p5512_p3), %s5345_s20, 128, %s5343_s13, %s2886_s18  }
0x18e9 PF: > { %s5513_s11 = sld [smem:[#allocation37_spill]]  ;;  %s5514_s24 = sld [smem:[#allocation45_spill]] }
0x18ea   : > { %p5516_p6 = scmp.ge.s32.totalorder %s4352_s23, 2 }
0x18ef   : > { %s2912_s21 = sand.u32 1, %s5513_s11   ;;  %p5515_p8 = scmp.ne.s32.totalorder %s5514_s24, 0 }
0x18f0   : > { %s2913_s30 = scalar_lea.sflag [#allocation4], %s2912_s21 }
0x18f1   : > { %p3697_p0 = pnand %p5516_p6, %p5515_p8 }
0x18f3   : > { %4327 = dma.done.wait (!%p3697_p0), %s2913_s30, 128  }
0x18f4   : > { %4329 = vsyncadd (!%p3697_p0), %s2913_s30, 4294967168  ;;  %s42_s23 = sadd.s32 1, %s4352_s23   ;;  %s5517_s17 = sld [smem:[#allocation38_spill]] }
0x18f5   : > { %p39_p13 = scmp.ge.s32.totalorder %s42_s23, 4   ;;  %s5518_s20 = sld [smem:[#allocation44_spill]] }
0x18f6   : > { %s5519_s9 = sld [smem:[#allocation42_spill]]  ;;  %s5520_s18 = smov %s4336_s19 }
0x18f7   : > { %s5522_s21 = smov %s4348_s22  ;;  %41 = sbr.rel (!%p39_p13) target bundleno = 28 (0x1c), region = 220 }
0x18fa   : > { %s5521_s19 = smov %s5517_s17 }
0x18fc   : > { %s5523_s22 = smov %s5519_s9 }
0x18fe   :  { %2918 = vsyncpa [#allocation3], 1 }
0x18ff   :  { %2920 = vsyncpa [#allocation3 + $0x1], 1 }
0x1900   :  { %2921 = vsyncpa [#allocation6], 1 }
0x1901   :  { %2923 = vsyncpa [#allocation6 + $0x1], 1 }
0x1902   :  { %2924 = vsyncpa [#allocation9], 1 }
0x1903   :  { %2926 = vsyncpa [#allocation9 + $0x1], 1 }
0x1904   :  { %2927 = vsyncpa [#allocation12], 1 }
0x1905   :  { %2928 = vsyncpa [#allocation15], 1 }
0x1906   :  { %2929 = vsyncpa [#allocation18], 1 }
0x1907   :  { %2930 = vsyncpa [#allocation21], 1 }
0x1908   :  { %2931 = vsyncpa [#allocation24], 1 }
0x1909   :  { %2932 = vsyncpa [#allocation4], 1 }
0x190a   :  { %2934 = vsyncpa [#allocation4 + $0x1], 1 }

</bundles_post_ra>
